<compile_context>
chip_gen: v5e
topology: v5e:2x2
jax: 0.10.0
libtpu: 0.0.40
codegen_flags: <defaults>
</compile_context>

<pallas_src>
import functools

import jax
import jax.numpy as jnp
from jax import lax
from jax.experimental import pallas as pl
from jax.experimental.pallas import tpu as pltpu


# ------------------------------ Pallas kernel ------------------------------- #

def _make_fused_kernel(*, H, W, Wpad, RIN, THO, Wo, stride, Cin, D, Cout,
                       compute_dtype):
    s = stride

    def kernel(x_ref, w1_ref, b1_ref, w2_ref, b2_ref, o_ref):
        # x_ref : (1, Hpad, Wpad, Cin)  resident zero-padded input image (per batch)
        # w1_ref: (Cin, D)              1x1 weights with BN1 scale folded in
        # b1_ref: (1, D)                BN1 shift
        # w2_ref: (9*D, Cout)           im2col 3x3 weights with BN2 scale folded in
        # b2_ref: (1, Cout)             BN2 shift
        # o_ref : (1, THO*Wo, Cout)     output row-tile (flattened rows x cols)
        ti = pl.program_id(1)
        row0 = pl.multiple_of(ti * (THO * s), THO * s)   # first padded row of tile

        # -------- stage 1: 1x1 conv (matmul) + BN shift + LeakyReLU --------
        x_slab = x_ref[0, pl.ds(row0, RIN), :, :]                 # (RIN, Wpad, Cin)
        x2 = x_slab.reshape(RIN * Wpad, Cin).astype(compute_dtype)
        h = jnp.dot(x2, w1_ref[...], preferred_element_type=jnp.float32)
        h = h + b1_ref[...]
        h = jnp.where(h >= 0, h, 0.1 * h)                         # LeakyReLU(0.1)
        h = h.reshape(RIN, Wpad, D)

        # Positions that correspond to the 3x3 conv's zero padding must be exactly
        # 0 in the intermediate map (the padded input is 0 there, but BN shift +
        # LeakyReLU would otherwise turn them into leaky(b1)).
        rows = row0 + lax.broadcasted_iota(jnp.int32, (RIN, Wpad, 1), 0)
        cols = lax.broadcasted_iota(jnp.int32, (RIN, Wpad, 1), 1)
        interior = (rows >= 1) & (rows <= H) & (cols >= 1) & (cols <= W)
        h = jnp.where(interior, h, 0.0)

        # -------- stage 2: 3x3 / stride conv as ONE wide-K im2col matmul --------
        def tap(dy, dx):
            r = h[dy:dy + s * THO]                        # rows dy, dy+1, ...
            if s > 1:
                # select rows dy, dy+s, ... (leading-dim regroup, layout-friendly)
                r = r.reshape(THO, s, Wpad, D)[:, 0]
                # select cols dx, dx+s, ...
                # TODO(synk): for large W use a strided pl.ds read from a VMEM
                #             scratch instead of per-column slices.
                cols_ = [r[:, dx + j * s:dx + j * s + 1, :] for j in range(Wo)]
                return jnp.concatenate(cols_, axis=1)     # (THO, Wo, D)
            return r[:, dx:dx + Wo, :]                    # (THO, Wo, D)

        taps = [tap(dy, dx) for dy in range(3) for dx in range(3)]
        t = jnp.concatenate(taps, axis=-1)                # (THO, Wo, 9*D)
        t = t.reshape(THO * Wo, 9 * D).astype(compute_dtype)
        y = jnp.dot(t, w2_ref[...], preferred_element_type=jnp.float32)
        y = y + b2_ref[...]                               # folded BN2 shift
        y = jnp.where(y >= 0, y, 0.1 * y)                 # LeakyReLU(0.1)
        # NOTE: for real YOLO channel counts (Cout >= 128) this store is lane-dense;
        # tiny Cout (toy config) unavoidably lowers to masked partial stores.
        o_ref[0] = y.astype(o_ref.dtype)

    return kernel


# ------------------------------ Host wrappers -------------------------------- #

def _pick_row_tile(ho):
    if ho % 8 == 0 and ho // 8 >= 2:
        return 8
    for t in (16, 8, 4, 2, 1):
        if ho % t == 0:
            return t
    return 1


def conv_block_forward_nhwc(x_nhwc, folded, stride=1, compute_dtype=jnp.float32,
                            row_tile=None):
    """Fused forward in NHWC. x_nhwc: (N, H, W, Cin) -> (N, Ho, Wo, Cout) float32."""
    w1f, b1, w2f, b2 = folded
    N, H, W, Cin = x_nhwc.shape
    D = w1f.shape[1]
    Cout = w2f.shape[1]
    s = int(stride)

    Ho = (H - 1) // s + 1          # matches 3x3 / pad=1 / stride=s conv
    Wo = (W - 1) // s + 1
    THO = row_tile if row_tile is not None else _pick_row_tile(Ho)
    assert Ho % THO == 0, (Ho, THO)
    Gr = Ho // THO
    RIN = s * THO + 2              # padded input rows needed per output row-tile
    Hpad = s * Ho + 2
    Wpad = s * Wo + 2

    # Zero-pad spatially on the host (the kernel masks these positions so the
    # intermediate feature map is an exact zero there, as a padded conv requires).
    x = x_nhwc.astype(compute_dtype)
    xp = jnp.pad(x, ((0, 0), (1, Hpad - H - 1), (1, Wpad - W - 1), (0, 0)))

    kernel = _make_fused_kernel(H=H, W=W, Wpad=Wpad, RIN=RIN, THO=THO, Wo=Wo,
                                stride=s, Cin=Cin, D=D, Cout=Cout,
                                compute_dtype=compute_dtype)

    flops = (2 * N * Gr * RIN * Wpad * Cin * D          # 1x1 conv stage
             + 2 * N * Ho * Wo * 9 * D * Cout)          # 3x3 conv stage
    bytes_accessed = (N * Hpad * Wpad * Cin * xp.dtype.itemsize
                      + N * Ho * Wo * Cout * 4
                      + w1f.size * w1f.dtype.itemsize
                      + w2f.size * w2f.dtype.itemsize
                      + (b1.size + b2.size) * 4)

    out3 = pl.pallas_call(
        kernel,
        out_shape=jax.ShapeDtypeStruct((N, Ho * Wo, Cout), jnp.float32),
        grid_spec=pltpu.PrefetchScalarGridSpec(
            num_scalar_prefetch=0,
            grid=(N, Gr),
            in_specs=[
                # Padded image stays resident across the row-tile axis (re-DMA'd
                # only when the batch index changes); halo rows sliced in-kernel.
                pl.BlockSpec((1, Hpad, Wpad, Cin), lambda n, ti: (n, 0, 0, 0)),
                pl.BlockSpec((Cin, D), lambda n, ti: (0, 0)),
                pl.BlockSpec((1, D), lambda n, ti: (0, 0)),
                pl.BlockSpec((9 * D, Cout), lambda n, ti: (0, 0)),
                pl.BlockSpec((1, Cout), lambda n, ti: (0, 0)),
            ],
            out_specs=pl.BlockSpec((1, THO * Wo, Cout), lambda n, ti: (n, ti, 0)),
        ),
        compiler_params=pltpu.CompilerParams(
            dimension_semantics=("parallel", "parallel"),
            vmem_limit_bytes=32 * 1024 * 1024,
        ),
        cost_estimate=pl.CostEstimate(flops=flops, transcendentals=0,
                                      bytes_accessed=bytes_accessed),
    )(xp, w1f, b1, w2f, b2)

    return out3.reshape(N, Ho, Wo, Cout)


def conv_block_forward(x_nchw, folded, stride=1, compute_dtype=jnp.float32):
    """NCHW wrapper matching the PyTorch interface.

    NOTE: run a full network in NHWC via conv_block_forward_nhwc to avoid the
    per-layer layout transposes around the memory-bound fused kernel.
    """
    x = jnp.transpose(x_nchw, (0, 2, 3, 1))
    y = conv_block_forward_nhwc(x, folded, stride=stride,
                                compute_dtype=compute_dtype)
    return jnp.transpose(y, (0, 3, 1, 2))


# --------------------------- Parameters (synthetic) -------------------------- #

def init_params(key, inp, oup, expand_ratio=0.5, eps=1e-5):
    """Deterministic synthetic parameters matching the PyTorch module shapes."""
    depth = int(oup * expand_ratio)
    ks = jax.random.split(key, 10)
    w1 = 0.2 * jax.random.normal(ks[0], (depth, inp, 1, 1), jnp.float32)   # OIHW
    g1 = 1.0 + 0.1 * jax.random.normal(ks[1], (depth,), jnp.float32)
    be1 = 0.1 * jax.random.normal(ks[2], (depth,), jnp.float32)
    m1 = 0.1 * jax.random.normal(ks[3], (depth,), jnp.float32)
    v1 = 0.5 + jax.random.uniform(ks[4], (depth,), jnp.float32)
    w2 = 0.2 * jax.random.normal(ks[5], (oup, depth, 3, 3), jnp.float32)   # OIHW
    g2 = 1.0 + 0.1 * jax.random.normal(ks[6], (oup,), jnp.float32)
    be2 = 0.1 * jax.random.normal(ks[7], (oup,), jnp.float32)
    m2 = 0.1 * jax.random.normal(ks[8], (oup,), jnp.float32)
    v2 = 0.5 + jax.random.uniform(ks[9], (oup,), jnp.float32)
    return dict(w1=w1, bn1=(g1, be1, m1, v1), w2=w2, bn2=(g2, be2, m2, v2), eps=eps)


def fold_params(p, compute_dtype=jnp.float32):
    """Fold BN scale into conv weights; build kernel-friendly matrices.

    Returns (w1f (Cin, D), b1 (1, D), w2f (9*D, Cout), b2 (1, Cout)).
    """
    eps = p["eps"]
    g1, be1, m1, v1 = p["bn1"]
    s1 = g1 / jnp.sqrt(v1 + eps)
    w1f = (jnp.transpose(p["w1"][:, :, 0, 0], (1, 0)) * s1[None, :]).astype(compute_dtype)
    b1 = (be1 - m1 * s1)[None, :].astype(jnp.float32)

    g2, be2, m2, v2 = p["bn2"]
    s2 = g2 / jnp.sqrt(v2 + eps)
    oup, depth = p["w2"].shape[0], p["w2"].shape[1]
    # (Cout, D, ky, kx) -> (ky, kx, D, Cout) -> (9*D, Cout); row index = (ky*3+kx)*D + d
    w2t = jnp.transpose(p["w2"], (2, 3, 1, 0)).reshape(9 * depth, oup)
    w2f = (w2t * s2[None, :]).astype(compute_dtype)
    b2 = (be2 - m2 * s2)[None, :].astype(jnp.float32)
    return (w1f, b1, w2f, b2)


# ------------------------------ Reference (JAX) ------------------------------ #

def reference_forward(x_nchw, p, stride=1):
    eps = p["eps"]
    dn = ("NCHW", "OIHW", "NCHW")

    def bn_lrelu(y, bn):
        g, b, m, v = bn
        y = (y - m[None, :, None, None]) * (g / jnp.sqrt(v + eps))[None, :, None, None] \
            + b[None, :, None, None]
        return jnp.where(y >= 0, y, 0.1 * y)

    y = lax.conv_general_dilated(x_nchw, p["w1"], (1, 1), "VALID", dimension_numbers=dn)
    y = bn_lrelu(y, p["bn1"])
    y = lax.conv_general_dilated(y, p["w2"], (stride, stride), ((1, 1), (1, 1)),
                                 dimension_numbers=dn)
    y = bn_lrelu(y, p["bn2"])
    return y


# ----------------------------------- Main ------------------------------------ #

if __name__ == "__main__":
    inp, oup = 4, 8
    N, H, W = 2, 16, 16

    key = jax.random.PRNGKey(0)
    kx, kp = jax.random.split(key)
    x = jax.random.normal(kx, (N, inp, H, W), jnp.float32)
    params = init_params(kp, inp, oup, expand_ratio=0.5)

    # f32 path, stride handled inside the kernel (test 1 and 2).
    folded_f32 = fold_params(params, jnp.float32)
    for stride in (1, 2):
        fwd = jax.jit(functools.partial(conv_block_forward, stride=stride,
                                        compute_dtype=jnp.float32))
        out = jax.block_until_ready(fwd(x, folded_f32))
        ref = jax.block_until_ready(reference_forward(x, params, stride=stride))
        assert out.shape == ref.shape, (stride, out.shape, ref.shape)
        err = float(jnp.max(jnp.abs(out - ref)))
        assert err < 1e-4, f"stride={stride} f32 max abs error {err}"

    # bf16 MXU path (v6e/v7x): bf16 matmul operands, f32 accumulation/elementwise.
    folded_bf16 = fold_params(params, jnp.bfloat16)
    fwd_bf16 = jax.jit(functools.partial(conv_block_forward, stride=1,
                                         compute_dtype=jnp.bfloat16))
    out_bf16 = jax.block_until_ready(fwd_bf16(x, folded_bf16))
    ref = jax.block_until_ready(reference_forward(x, params, stride=1))
    err = float(jnp.max(jnp.abs(out_bf16 - ref)))
    assert err < 1e-1, f"bf16 max abs error {err}"

    print("KERNEL_OK")
</pallas_src>

<mosaic_0001>
module attributes {stable_mosaic.version = 11 : i64} {
  func.func @kernel(%arg0: i32, %arg1: i32, %arg2: memref<1x18x18x4xf32, #tpu.memory_space<vmem>>, %arg3: memref<4x4xf32, #tpu.memory_space<vmem>>, %arg4: memref<1x4xf32, #tpu.memory_space<vmem>>, %arg5: memref<36x8xf32, #tpu.memory_space<vmem>>, %arg6: memref<1x8xf32, #tpu.memory_space<vmem>>, %arg7: memref<1x128x8xf32, #tpu.memory_space<vmem>>) attributes {dimension_semantics = [#tpu.dimension_semantics<parallel>, #tpu.dimension_semantics<parallel>], iteration_bounds = array<i64: 2, 2>, scalar_prefetch = 0 : i64, scratch_operands = 0 : i64, tpu.core_type = #tpu.core_type<tc>, window_params = [{transform_indices = @transform_0, window_bounds = array<i64: 1, 18, 18, 4>}, {pipeline_mode = #tpu.pipeline_mode<synchronous>, transform_indices = @transform_1, window_bounds = array<i64: 4, 4>}, {pipeline_mode = #tpu.pipeline_mode<synchronous>, transform_indices = @transform_2, window_bounds = array<i64: 1, 4>}, {pipeline_mode = #tpu.pipeline_mode<synchronous>, transform_indices = @transform_3, window_bounds = array<i64: 36, 8>}, {pipeline_mode = #tpu.pipeline_mode<synchronous>, transform_indices = @transform_4, window_bounds = array<i64: 1, 8>}, {transform_indices = @transform_5, window_bounds = array<i64: 1, 128, 8>}]} {
    %c8_i32 = arith.constant 8 : i32
    %0 = arith.muli %arg1, %c8_i32 : i32
    %1 = tpu.assume_multiple %0, 8 : i32
    %c0 = arith.constant 0 : index
    %2 = arith.index_cast %1 : i32 to index
    %c0_0 = arith.constant 0 : index
    %c0_1 = arith.constant 0 : index
    %3 = vector.load %arg2[%c0, %2, %c0_0, %c0_1] : memref<1x18x18x4xf32, #tpu.memory_space<vmem>>, vector<1x10x18x4xf32>
    %4 = vector.shape_cast %3 : vector<1x10x18x4xf32> to vector<10x18x4xf32>
    %5 = vector.shape_cast %4 : vector<10x18x4xf32> to vector<180x4xf32>
    %c0_2 = arith.constant 0 : index
    %c0_3 = arith.constant 0 : index
    %6 = vector.load %arg3[%c0_2, %c0_3] : memref<4x4xf32, #tpu.memory_space<vmem>>, vector<4x4xf32>
    %cst = arith.constant dense<0.000000e+00> : vector<180x4xf32>
    %7 = tpu.matmul %5, %6, %cst {dimension_numbers = #tpu.dot_dimension_numbers<[1], [0], [0], [1], [0, 0, 1, 1], [], []>} : vector<180x4xf32>, vector<4x4xf32>, vector<180x4xf32> -> vector<180x4xf32>
    %c0_4 = arith.constant 0 : index
    %c0_5 = arith.constant 0 : index
    %8 = vector.load %arg4[%c0_4, %c0_5] : memref<1x4xf32, #tpu.memory_space<vmem>>, vector<1x4xf32>
    %9 = vector.broadcast %8 : vector<1x4xf32> to vector<180x4xf32>
    %10 = arith.addf %7, %9 : vector<180x4xf32>
    %cst_6 = arith.constant 0.000000e+00 : f32
    %11 = vector.broadcast %cst_6 : f32 to vector<180x4xf32>
    %12 = arith.cmpf oge, %10, %11 : vector<180x4xf32>
    %cst_7 = arith.constant 1.000000e-01 : f32
    %13 = vector.broadcast %cst_7 : f32 to vector<180x4xf32>
    %14 = arith.mulf %13, %10 : vector<180x4xf32>
    %15 = arith.select %12, %10, %14 : vector<180x4xi1>, vector<180x4xf32>
    %16 = vector.shape_cast %15 : vector<180x4xf32> to vector<10x18x4xf32>
    %17 = tpu.iota {dimensions = array<i32: 0>} : vector<10x18x1xi32>
    %18 = vector.broadcast %1 : i32 to vector<10x18x1xi32>
    %19 = arith.addi %18, %17 : vector<10x18x1xi32>
    %20 = tpu.iota {dimensions = array<i32: 1>} : vector<10x18x1xi32>
    %c1_i32 = arith.constant 1 : i32
    %21 = vector.broadcast %c1_i32 : i32 to vector<10x18x1xi32>
    %22 = arith.cmpi sge, %19, %21 : vector<10x18x1xi32>
    %c16_i32 = arith.constant 16 : i32
    %23 = vector.broadcast %c16_i32 : i32 to vector<10x18x1xi32>
    %24 = arith.cmpi sle, %19, %23 : vector<10x18x1xi32>
    %25 = arith.andi %22, %24 : vector<10x18x1xi1>
    %c1_i32_8 = arith.constant 1 : i32
    %26 = vector.broadcast %c1_i32_8 : i32 to vector<10x18x1xi32>
    %27 = arith.cmpi sge, %20, %26 : vector<10x18x1xi32>
    %28 = arith.andi %25, %27 : vector<10x18x1xi1>
    %c16_i32_9 = arith.constant 16 : i32
    %29 = vector.broadcast %c16_i32_9 : i32 to vector<10x18x1xi32>
    %30 = arith.cmpi sle, %20, %29 : vector<10x18x1xi32>
    %31 = arith.andi %28, %30 : vector<10x18x1xi1>
    %cst_10 = arith.constant 0.000000e+00 : f32
    %32 = vector.shape_cast %31 : vector<10x18x1xi1> to vector<10x18x1xi1>
    %33 = vector.broadcast %32 : vector<10x18x1xi1> to vector<10x18x4xi1>
    %34 = vector.broadcast %cst_10 : f32 to vector<10x18x4xf32>
    %35 = arith.select %33, %16, %34 : vector<10x18x4xi1>, vector<10x18x4xf32>
    %36 = vector.extract_strided_slice %35 {offsets = [0, 0, 0], sizes = [8, 18, 4], strides = [1, 1, 1]} : vector<10x18x4xf32> to vector<8x18x4xf32>
    %37 = vector.extract_strided_slice %36 {offsets = [0, 0, 0], sizes = [8, 16, 4], strides = [1, 1, 1]} : vector<8x18x4xf32> to vector<8x16x4xf32>
    %38 = vector.extract_strided_slice %35 {offsets = [0, 0, 0], sizes = [8, 18, 4], strides = [1, 1, 1]} : vector<10x18x4xf32> to vector<8x18x4xf32>
    %39 = vector.extract_strided_slice %38 {offsets = [0, 1, 0], sizes = [8, 16, 4], strides = [1, 1, 1]} : vector<8x18x4xf32> to vector<8x16x4xf32>
    %40 = vector.extract_strided_slice %35 {offsets = [0, 0, 0], sizes = [8, 18, 4], strides = [1, 1, 1]} : vector<10x18x4xf32> to vector<8x18x4xf32>
    %41 = vector.extract_strided_slice %40 {offsets = [0, 2, 0], sizes = [8, 16, 4], strides = [1, 1, 1]} : vector<8x18x4xf32> to vector<8x16x4xf32>
    %42 = vector.extract_strided_slice %35 {offsets = [1, 0, 0], sizes = [8, 18, 4], strides = [1, 1, 1]} : vector<10x18x4xf32> to vector<8x18x4xf32>
    %43 = vector.extract_strided_slice %42 {offsets = [0, 0, 0], sizes = [8, 16, 4], strides = [1, 1, 1]} : vector<8x18x4xf32> to vector<8x16x4xf32>
    %44 = vector.extract_strided_slice %35 {offsets = [1, 0, 0], sizes = [8, 18, 4], strides = [1, 1, 1]} : vector<10x18x4xf32> to vector<8x18x4xf32>
    %45 = vector.extract_strided_slice %44 {offsets = [0, 1, 0], sizes = [8, 16, 4], strides = [1, 1, 1]} : vector<8x18x4xf32> to vector<8x16x4xf32>
    %46 = vector.extract_strided_slice %35 {offsets = [1, 0, 0], sizes = [8, 18, 4], strides = [1, 1, 1]} : vector<10x18x4xf32> to vector<8x18x4xf32>
    %47 = vector.extract_strided_slice %46 {offsets = [0, 2, 0], sizes = [8, 16, 4], strides = [1, 1, 1]} : vector<8x18x4xf32> to vector<8x16x4xf32>
    %48 = vector.extract_strided_slice %35 {offsets = [2, 0, 0], sizes = [8, 18, 4], strides = [1, 1, 1]} : vector<10x18x4xf32> to vector<8x18x4xf32>
    %49 = vector.extract_strided_slice %48 {offsets = [0, 0, 0], sizes = [8, 16, 4], strides = [1, 1, 1]} : vector<8x18x4xf32> to vector<8x16x4xf32>
    %50 = vector.extract_strided_slice %35 {offsets = [2, 0, 0], sizes = [8, 18, 4], strides = [1, 1, 1]} : vector<10x18x4xf32> to vector<8x18x4xf32>
    %51 = vector.extract_strided_slice %50 {offsets = [0, 1, 0], sizes = [8, 16, 4], strides = [1, 1, 1]} : vector<8x18x4xf32> to vector<8x16x4xf32>
    %52 = vector.extract_strided_slice %35 {offsets = [2, 0, 0], sizes = [8, 18, 4], strides = [1, 1, 1]} : vector<10x18x4xf32> to vector<8x18x4xf32>
    %53 = vector.extract_strided_slice %52 {offsets = [0, 2, 0], sizes = [8, 16, 4], strides = [1, 1, 1]} : vector<8x18x4xf32> to vector<8x16x4xf32>
    %54 = tpu.concatenate %37, %39, %41, %43, %45, %47, %49, %51, %53 in 2 : vector<8x16x4xf32>, vector<8x16x4xf32>, vector<8x16x4xf32>, vector<8x16x4xf32>, vector<8x16x4xf32>, vector<8x16x4xf32>, vector<8x16x4xf32>, vector<8x16x4xf32>, vector<8x16x4xf32> -> vector<8x16x36xf32>
    %55 = vector.shape_cast %54 : vector<8x16x36xf32> to vector<128x36xf32>
    %c0_11 = arith.constant 0 : index
    %c0_12 = arith.constant 0 : index
    %56 = vector.load %arg5[%c0_11, %c0_12] : memref<36x8xf32, #tpu.memory_space<vmem>>, vector<36x8xf32>
    %cst_13 = arith.constant dense<0.000000e+00> : vector<128x8xf32>
    %57 = tpu.matmul %55, %56, %cst_13 {dimension_numbers = #tpu.dot_dimension_numbers<[1], [0], [0], [1], [0, 0, 1, 1], [], []>} : vector<128x36xf32>, vector<36x8xf32>, vector<128x8xf32> -> vector<128x8xf32>
    %c0_14 = arith.constant 0 : index
    %c0_15 = arith.constant 0 : index
    %58 = vector.load %arg6[%c0_14, %c0_15] : memref<1x8xf32, #tpu.memory_space<vmem>>, vector<1x8xf32>
    %59 = vector.broadcast %58 : vector<1x8xf32> to vector<128x8xf32>
    %60 = arith.addf %57, %59 : vector<128x8xf32>
    %cst_16 = arith.constant 0.000000e+00 : f32
    %61 = vector.broadcast %cst_16 : f32 to vector<128x8xf32>
    %62 = arith.cmpf oge, %60, %61 : vector<128x8xf32>
    %cst_17 = arith.constant 1.000000e-01 : f32
    %63 = vector.broadcast %cst_17 : f32 to vector<128x8xf32>
    %64 = arith.mulf %63, %60 : vector<128x8xf32>
    %65 = arith.select %62, %60, %64 : vector<128x8xi1>, vector<128x8xf32>
    %c0_18 = arith.constant 0 : index
    %c0_19 = arith.constant 0 : index
    %c0_20 = arith.constant 0 : index
    %66 = vector.load %arg7[%c0_18, %c0_19, %c0_20] : memref<1x128x8xf32, #tpu.memory_space<vmem>>, vector<1x128x8xf32>
    %67 = vector.shape_cast %66 : vector<1x128x8xf32> to vector<128x8xf32>
    %68 = vector.shape_cast %65 : vector<128x8xf32> to vector<1x128x8xf32>
    tpu.vector_store %arg7[%c0_18, %c0_19, %c0_20], %68 {strides = array<i32>} : memref<1x128x8xf32, #tpu.memory_space<vmem>>, vector<1x128x8xf32>,
    return
  }
  func.func @transform_0(%arg0: i32, %arg1: i32) -> (i32, i32, i32, i32) {
    %c0_i32 = arith.constant 0 : i32
    %c0_i32_0 = arith.constant 0 : i32
    %c0_i32_1 = arith.constant 0 : i32
    %c0_i32_2 = arith.constant 0 : i32
    return %arg0, %c0_i32, %c0_i32_0, %c0_i32_1 : i32, i32, i32, i32
  }
  func.func @transform_1(%arg0: i32, %arg1: i32) -> (i32, i32) {
    %c0_i32 = arith.constant 0 : i32
    %c0_i32_0 = arith.constant 0 : i32
    %c0_i32_1 = arith.constant 0 : i32
    return %c0_i32, %c0_i32_0 : i32, i32
  }
  func.func @transform_2(%arg0: i32, %arg1: i32) -> (i32, i32) {
    %c0_i32 = arith.constant 0 : i32
    %c0_i32_0 = arith.constant 0 : i32
    %c0_i32_1 = arith.constant 0 : i32
    return %c0_i32, %c0_i32_0 : i32, i32
  }
  func.func @transform_3(%arg0: i32, %arg1: i32) -> (i32, i32) {
    %c0_i32 = arith.constant 0 : i32
    %c0_i32_0 = arith.constant 0 : i32
    %c0_i32_1 = arith.constant 0 : i32
    return %c0_i32, %c0_i32_0 : i32, i32
  }
  func.func @transform_4(%arg0: i32, %arg1: i32) -> (i32, i32) {
    %c0_i32 = arith.constant 0 : i32
    %c0_i32_0 = arith.constant 0 : i32
    %c0_i32_1 = arith.constant 0 : i32
    return %c0_i32, %c0_i32_0 : i32, i32
  }
  func.func @transform_5(%arg0: i32, %arg1: i32) -> (i32, i32, i32) {
    %c0_i32 = arith.constant 0 : i32
    %c0_i32_0 = arith.constant 0 : i32
    return %arg0, %arg1, %c0_i32 : i32, i32, i32
  }
}

</mosaic_0001>

<bundles_post_ra>
// kernel: conv_block_forward.1
= control target key start
LH: loop header
LB: loop body
LE: loop exit
PB: predicated region body
PF: predicated region fallthrough
CT: control target
= control target key end

     0   :  { %s2267_s18 = smov 0   ;;  %s2269_s19 = smov 0   ;;  %s3384_s0 = inlined_call_operand.vmem [shape: f32[2,18,18,4], index: 0, kind: input, shape index: {}]   ;;  %s3385_s1 = inlined_call_operand.vmem [shape: f32[4,4], index: 1, kind: input, shape index: {}]   ;;  %s3386_s2 = inlined_call_operand.vmem [shape: f32[1,4], index: 2, kind: input, shape index: {}]   ;;  %s3387_s3 = inlined_call_operand.vmem [shape: f32[36,8], index: 3, kind: input, shape index: {}]   ;;  %s3388_s4 = inlined_call_operand.vmem [shape: f32[1,8], index: 4, kind: input, shape index: {}]   ;;  %s3389_s5 = inlined_call_operand.vmem [shape: f32[2,256,8], index: 5, kind: output, shape index: {}]  }
   0x1   :  { %s2271_s20 = smov 0   ;;  %s2273_s21 = smov 0  }
   0x2   :  { %s2275_s22 = smov 0  }
   0x3 LB: > { %s24_s23 = sadd.s32 1, %s2219_s20  ;;  %s27_s24 = sadd.s32 1, %s2223_s21  ;;  %s2227_s22 = sphi %s2275_s22, %s15_s22   ;;  %s2223_s21 = sphi %s2273_s21, %s3442_s21   ;;  %s2219_s20 = sphi %s2271_s20, %s3441_s20   ;;  %s2215_s19 = sphi %s2269_s19, %s3440_s19   ;;  %s2211_s18 = sphi %s2267_s18, %s3439_s18  }
   0x4   : > { %p25_p0 = scmp.ge.s32.totalorder %s24_s23, 2  ;;  %p2080_p1 = scmp.ge.s32.totalorder %s2227_s22, 1 }
   0x5   : > { %p201_p2 = scmp.lt.s32.totalorder %s2227_s22, 5 }
   0x6   : > { %s3444_s23 = smov (%p25_p0, %s24_s23), 0  ;;  %s3446_s24 = smov (!%p25_p0, %s27_s24), %s2223_s21 }
   0x7   : > { %p202_p3 = pnand %p2080_p1, %p201_p2  ;;  %p29_p4 = scmp.ge.s32.totalorder %s3446_s24, 2 }
   0x8   : > { %p233_p5 = scmp.lt.s32.totalorder (!%p202_p3), %s2215_s19, 1  ;;  %s2086_s27 = smul.u32 (!%p202_p3), 192, %s2211_s18 }
   0x9   : > { %s3448_s24 = smov (%p29_p4, %s3446_s24), 0  ;;  %205 = sbr.rel (%p202_p3) target bundleno = 783 (0x30f), region = 40 }
   0xa   : > { %s2085_s10 = sshll.u32 (!%p202_p3), %s2211_s18, 3  ;;  %s2229_s11 = smov (!%p202_p3), 8  }
   0xb   : > { %s2230_s12 = smov (!%p202_p3), 4   ;;  %s2231_s13 = smov (!%p202_p3), 12  }
   0xc   : > { %s2232_s14 = smov (!%p202_p3), 16   ;;  %s2233_s15 = smov (!%p202_p3), 20  }
   0xd   : > { %s2234_s16 = smov (!%p202_p3), 24   ;;  %s2235_s17 = smov (!%p202_p3), 28  }
   0xe   : > { %v371_v0 = vld [vmem:[%s3385_s1] sm:$0xf]  ;;  %vm543_vm0 = vcmask 1043456   ;;  %s3450_s19 = smov (!%p233_p5, %s2215_s19), 1  ;;  %vm496_vm1 = vcmask 31744   ;;  %vm1262_vm11 = vcmask 1045504  }
   0xf   : > { %2087 = vmatpush.msk.msra.mxu0 %vm543_vm0, %v371_v0  ;;  %2130 = vmatpush.msk.msra.mxu2 %vm543_vm0, %v371_v0  ;;  %s2137_s28 = smul.u32 432, %s3450_s19  ;;  %vm1173_vm12 = vcmask 1046528   ;;  %s2236_s25 = smov 32  }
  0x10   : > { %2131 = vmatpush.msk.msra.mxu3 %vm543_vm0, %v371_v0 }
  0x11   : > { %s237_s6 = scalar_lea.vmem %s3384_s0, %s2137_s28 }
  0x12   : > { %s2312_s7 = scalar_lea.vmem %s237_s6, %s2086_s27 }
  0x13   : > { %v251_v1 = vld [vmem:[%s2312_s7] sm:$0xff]  ;;  %v252_v2 = vld [vmem:[%s2312_s7 + $0x8] sm:$0xff]  ;;  %v254_v9 = vld [vmem:[%s2312_s7 + $0x18] sm:$0xff] }
  0x14   : > { %v311_v3 = vrot.slane %v251_v1, 2  ;;  %v312_v4 = vrot.slane %v251_v1, 4  ;;  %v313_v5 = vrot.slane %v251_v1, 6  ;;  %376 = vst [vmem:[#allocation1] ss:$4 sm:$0xff] %v251_v1  ;;  %v314_v6 = vrot.slane %v252_v2, 2 }
  0x15   : > { %384 = vst [vmem:[#allocation1 + $0x20] ss:$4 sm:$0xff] %v252_v2  ;;  %v315_v7 = vrot.slane %v252_v2, 4  ;;  %v316_v8 = vrot.slane %v252_v2, 6  ;;  %v253_v10 = vld [vmem:[%s2312_s7 + $0x10] sm:$0x3] }
  0x16   : > { %378 = vst [vmem:[#allocation1 + $0x1] ss:$4 sm:$0xff] %v311_v3  ;;  %v317_v11 = vrot.slane %v254_v9, 2  ;;  %v318_v13 = vrot.slane %v254_v9, 4  ;;  %v255_v14 = vld [vmem:[%s2312_s7 + $0x20] sm:$0xff]  ;;  %v319_v15 = vrot.slane %v254_v9, 6 }
  0x17   : > { %380 = vst [vmem:[#allocation1 + $0x2] ss:$4 sm:$0xff] %v312_v4  ;;  %v320_v16 = vrot.slane %v255_v14, 2  ;;  %v321_v18 = vrot.slane %v255_v14, 4  ;;  %v257_v19 = vld [vmem:[%s2312_s7 + $0x30] sm:$0xff]  ;;  %v322_v20 = vrot.slane %v255_v14, 6 }
  0x18   : > { %382 = vst [vmem:[#allocation1 + $0x3] ss:$4 sm:$0xff] %v313_v5  ;;  %v256_v21 = vld [vmem:[%s2312_s7 + $0x28] sm:$0x3]  ;;  %v323_v23 = vrot.slane %v257_v19, 2  ;;  %v258_v24 = vld [vmem:[%s2312_s7 + $0x38] sm:$0xff] }
  0x19   : > { %386 = vst [vmem:[#allocation1 + $0x21] ss:$4 sm:$0xff] %v314_v6  ;;  %v324_v25 = vrot.slane %v257_v19, 4  ;;  %v325_v26 = vrot.slane %v257_v19, 6  ;;  %v326_v28 = vrot.slane %v258_v24, 2  ;;  %v327_v29 = vrot.slane %v258_v24, 4 }
  0x1a   : > { %388 = vst [vmem:[#allocation1 + $0x22] ss:$4 sm:$0xff] %v315_v7  ;;  %v328_v30 = vrot.slane %v258_v24, 6  ;;  %v259_v32 = vld [vmem:[%s2312_s7 + $0x40] sm:$0x3]  ;;  %v260_v33 = vld [vmem:[%s2312_s7 + $0x48] sm:$0xff] }
  0x1b   : > { %390 = vst [vmem:[#allocation1 + $0x23] ss:$4 sm:$0xff] %v316_v8  ;;  %v329_v34 = vrot.slane %v260_v33, 2  ;;  %v330_v35 = vrot.slane %v260_v33, 4  ;;  %v331_v36 = vrot.slane %v260_v33, 6  ;;  %v261_v38 = vld [vmem:[%s2312_s7 + $0x50] sm:$0xff] }
  0x1c   : > { %v332_v39 = vrot.slane %v261_v38, 2  ;;  %v333_v40 = vrot.slane %v261_v38, 4  ;;  %v334_v41 = vrot.slane %v261_v38, 6  ;;  %v262_v43 = vld [vmem:[%s2312_s7 + $0x58] sm:$0x3]  ;;  %v264_v44 = vld [vmem:[%s2312_s7 + $0x68] sm:$0xff] }
  0x1d   : > { %v338_v45 = vrot.slane %v264_v44, 2  ;;  %v339_v46 = vrot.slane %v264_v44, 4  ;;  %v340_v48 = vrot.slane %v264_v44, 6  ;;  %v266_v49 = vld [vmem:[%s2312_s7 + $0x78] sm:$0xff]  ;;  %v267_v51 = vld [vmem:[%s2312_s7 + $0x80] sm:$0xff]  ;;  %v269_v60 = vld [vmem:[%s2312_s7 + $0x90] sm:$0xff] }
  0x1e   : > { %v263_v52 = vld [vmem:[%s2312_s7 + $0x60] sm:$0xff]  ;;  %v343_v53 = vrot.slane %v266_v49, 6  ;;  %v344_v56 = vrot.slane %v267_v51, 2  ;;  %v345_v57 = vrot.slane %v267_v51, 4  ;;  %v270_v61 = vld [vmem:[%s2312_s7 + $0x98] sm:$0xff]  ;;  %v348_v62 = vrot.slane %v269_v60, 4 }
  0x1f   : > { %v391_v12 = vld.sshfl [vmem:[#allocation1] sm:$0xff pattern:$0x73625140]  ;;  %v335_v54 = vrot.slane %v263_v52, 2  ;;  %v336_v55 = vrot.slane %v263_v52, 4  ;;  %v337_v59 = vrot.slane %v263_v52, 6 }
  0x20   : > { %2088 = vmatmul.msk.f32.vlgmr.msra.gmra.mxu0 %vm496_vm1, %v391_v12  ;;  %393 = vst [vmem:[#allocation1] ss:$4 sm:$0xff] %v253_v10  ;;  %v349_v63 = vrot.slane %v269_v60, 6  ;;  %v350_v0 = vrot.slane %v270_v61, 2  ;;  %v265_v3 = vld [vmem:[%s2312_s7 + $0x70] sm:$0x3] }
  0x21   : > { %394 = vst [vmem:[#allocation1 + $0x1] ss:$4 sm:$0xff] %v254_v9  ;;  %v341_v4 = vrot.slane %v266_v49, 2  ;;  %v342_v5 = vrot.slane %v266_v49, 4  ;;  %v272_v6 = vld [vmem:[%s2312_s7 + $0xa8] sm:$0xff]  ;;  %v346_v12 = vrot.slane %v267_v51, 6 }
  0x22   : > { %395 = vst [vmem:[#allocation1 + $0x2] ss:$4 sm:$0xff] %v317_v11  ;;  %v392_v17 = vld.sshfl [vmem:[#allocation1 + $0x20] sm:$0xff pattern:$0x73625140]  ;;  %v353_v7 = vrot.slane %v272_v6, 2 }
  0x23   : > { %396 = vst [vmem:[#allocation1 + $0x3] ss:$4 sm:$0xff] %v318_v13  ;;  %v354_v8 = vrot.slane %v272_v6, 4  ;;  %v355_v9 = vrot.slane %v272_v6, 6  ;;  %v273_v11 = vld [vmem:[%s2312_s7 + $0xb0] sm:$0xff] }
  0x24   : > { %397 = vst [vmem:[#allocation1 + $0x20] ss:$4 sm:$0xff] %v319_v15  ;;  %v268_v13 = vld [vmem:[%s2312_s7 + $0x88] sm:$0x3] }
  0x25   : > { %398 = vst [vmem:[#allocation1 + $0x21] ss:$4 sm:$0xff] %v255_v14  ;;  %v347_v14 = vrot.slane %v269_v60, 2 }
  0x26   : > { %399 = vst [vmem:[#allocation1 + $0x22] ss:$4 sm:$0xff] %v320_v16  ;;  %v275_v16 = vld [vmem:[%s2312_s7 + $0xc0] sm:$0xff] }
  0x27   : > { %400 = vst [vmem:[#allocation1 + $0x23] ss:$4 sm:$0xff] %v321_v18  ;;  %v360_v18 = vrot.slane %v275_v16, 4 }
  0x28   : > { %2089 = vmatmul.msk.f32.gmra.mxu0 %vm496_vm1, %v392_v17  ;;  %v359_v17 = vrot.slane %v275_v16, 2 }
  0x2a   : > { %v401_v22 = vld.sshfl [vmem:[#allocation1] sm:$0xff pattern:$0x73625140] }
  0x2b   : > { %403 = vst [vmem:[#allocation1] ss:$4 sm:$0xff] %v322_v20 }
  0x2c   : > { %404 = vst [vmem:[#allocation1 + $0x1] ss:$4 sm:$0xff] %v256_v21  ;;  %v351_v21 = vrot.slane %v270_v61, 4 }
  0x2d   : > { %405 = vst [vmem:[#allocation1 + $0x2] ss:$4 sm:$0xff] %v257_v19  ;;  %v361_v19 = vrot.slane %v275_v16, 6 }
  0x2e   : > { %v402_v27 = vld.sshfl [vmem:[#allocation1 + $0x20] sm:$0xff pattern:$0x73625140]  ;;  %406 = vst [vmem:[#allocation1 + $0x3] ss:$4 sm:$0xff] %v323_v23 }
  0x2f   : > { %407 = vst [vmem:[#allocation1 + $0x20] ss:$4 sm:$0xff] %v324_v25  ;;  %v271_v23 = vld [vmem:[%s2312_s7 + $0xa0] sm:$0x3]  ;;  %v278_v25 = vld [vmem:[%s2312_s7 + $0xd8] sm:$0xff] }
  0x30   : > { %2090 = vmatmul.msk.f32.gmra.mxu0 %vm496_vm1, %v401_v22  ;;  %408 = vst [vmem:[#allocation1 + $0x21] ss:$4 sm:$0xff] %v325_v26  ;;  %v352_v22 = vrot.slane %v270_v61, 6  ;;  %v277_v26 = vld [vmem:[%s2312_s7 + $0xd0] sm:$0x3] }
  0x31   : > { %409 = vst [vmem:[#allocation1 + $0x22] ss:$4 sm:$0xff] %v258_v24 }
  0x32   : > { %410 = vst [vmem:[#allocation1 + $0x23] ss:$4 sm:$0xff] %v326_v28  ;;  %v366_v28 = vrot.slane %v278_v25, 4 }
  0x35   : > { %v411_v31 = vld.sshfl [vmem:[#allocation1] sm:$0xff pattern:$0x73625140] }
  0x36   : > { %413 = vst [vmem:[#allocation1] ss:$4 sm:$0xff] %v327_v29 }
  0x37   : > { %414 = vst [vmem:[#allocation1 + $0x1] ss:$4 sm:$0xff] %v328_v30  ;;  %v356_v30 = vrot.slane %v273_v11, 2 }
  0x38   : > { %2091 = vmatmul.msk.f32.gmra.mxu0 %vm496_vm1, %v402_v27  ;;  %415 = vst [vmem:[#allocation1 + $0x2] ss:$4 sm:$0xff] %v259_v32  ;;  %v365_v27 = vrot.slane %v278_v25, 2  ;;  %v358_v32 = vrot.slane %v273_v11, 6 }
  0x39   : > { %v412_v37 = vld.sshfl [vmem:[#allocation1 + $0x20] sm:$0xff pattern:$0x73625140]  ;;  %416 = vst [vmem:[#allocation1 + $0x3] ss:$4 sm:$0xff] %v260_v33 }
  0x3a   : > { %417 = vst [vmem:[#allocation1 + $0x20] ss:$4 sm:$0xff] %v329_v34  ;;  %v279_v33 = vld [vmem:[%s2312_s7 + $0xe0] sm:$0xff] }
  0x3b   : > { %418 = vst [vmem:[#allocation1 + $0x21] ss:$4 sm:$0xff] %v330_v35  ;;  %v274_v35 = vld [vmem:[%s2312_s7 + $0xb8] sm:$0x3] }
  0x3c   : > { %419 = vst [vmem:[#allocation1 + $0x22] ss:$4 sm:$0xff] %v331_v36  ;;  %v370_v36 = vrot.slane %v279_v33, 6 }
  0x3d   : > { %420 = vst [vmem:[#allocation1 + $0x23] ss:$4 sm:$0xff] %v261_v38 }
  0x40   : > { %2092 = vmatmul.msk.f32.gmra.mxu0 %vm496_vm1, %v411_v31  ;;  %v421_v42 = vld.sshfl [vmem:[#allocation1] sm:$0xff pattern:$0x73625140]  ;;  %v357_v31 = vrot.slane %v273_v11, 4 }
  0x41   : > { %423 = vst [vmem:[#allocation1] ss:$4 sm:$0xff] %v332_v39  ;;  %v276_v39 = vld [vmem:[%s2312_s7 + $0xc8] sm:$0xff] }
  0x42   : > { %424 = vst [vmem:[#allocation1 + $0x1] ss:$4 sm:$0xff] %v333_v40  ;;  %v362_v40 = vrot.slane %v276_v39, 2 }
  0x43   : > { %425 = vst [vmem:[#allocation1 + $0x2] ss:$4 sm:$0xff] %v334_v41  ;;  %v363_v41 = vrot.slane %v276_v39, 4 }
  0x44   : > { %426 = vst [vmem:[#allocation1 + $0x3] ss:$4 sm:$0xff] %v262_v43  ;;  %v422_v50 = vld.sshfl [vmem:[#allocation1 + $0x20] sm:$0xff pattern:$0x73625140] }
  0x45   : > { %427 = vst [vmem:[#allocation1 + $0x20] ss:$4 sm:$0xff] %v263_v52 }
  0x46   : > { %428 = vst [vmem:[#allocation1 + $0x21] ss:$4 sm:$0xff] %v335_v54 }
  0x47   : > { %429 = vst [vmem:[#allocation1 + $0x22] ss:$4 sm:$0xff] %v336_v55 }
  0x48   : > { %2093 = vmatmul.msk.f32.gmra.mxu0 %vm496_vm1, %v412_v37  ;;  %430 = vst [vmem:[#allocation1 + $0x23] ss:$4 sm:$0xff] %v337_v59  ;;  %v280_v37 = vld [vmem:[%s2312_s7 + $0xe8] sm:$0x3]  ;;  %v802_v59 = vlaneseq }
  0x4b   : > { %v431_v47 = vld.sshfl [vmem:[#allocation1] sm:$0xff pattern:$0x73625140] }
  0x4c   : > { %433 = vst [vmem:[#allocation1] ss:$4 sm:$0xff] %v264_v44  ;;  %v2367_v44 = vld [vmem:[%s3386_s2] ss:$0 sm:$0xff] }
  0x4d   : > { %434 = vst [vmem:[#allocation1 + $0x1] ss:$4 sm:$0xff] %v338_v45  ;;  %v367_v45 = vrot.slane %v278_v25, 6 }
  0x4e   : > { %435 = vst [vmem:[#allocation1 + $0x2] ss:$4 sm:$0xff] %v339_v46  ;;  %v368_v46 = vrot.slane %v279_v33, 2 }
  0x4f   : > { %436 = vst [vmem:[#allocation1 + $0x3] ss:$4 sm:$0xff] %v340_v48  ;;  %v432_v2 = vld.sshfl [vmem:[#allocation1 + $0x20] sm:$0xff pattern:$0x73625140] }
  0x50   : > { %2094 = vmatmul.msk.f32.gmra.mxu0 %vm496_vm1, %v421_v42  ;;  %438 = vst [vmem:[#allocation1 + $0x21] ss:$4 sm:$0xff] %v266_v49  ;;  %v364_v42 = vrot.slane %v276_v39, 6 }
  0x51   : > { %437 = vst [vmem:[#allocation1 + $0x20] ss:$4 sm:$0xff] %v265_v3 }
  0x52   : > { %439 = vst [vmem:[#allocation1 + $0x22] ss:$4 sm:$0xff] %v341_v4 }
  0x53   : > { %440 = vst [vmem:[#allocation1 + $0x23] ss:$4 sm:$0xff] %v342_v5 }
  0x56   : > { %v441_v58 = vld.sshfl [vmem:[#allocation1] sm:$0xff pattern:$0x73625140] }
  0x57   : > { %443 = vst [vmem:[#allocation1] ss:$4 sm:$0xff] %v343_v53  ;;  %2098 = vmatmul.msk.f32.vlgmr.msra.gmra.mxu2 %vm496_vm1, %v441_v58 }
  0x58   : > { %2095 = vmatmul.msk.f32.gmra.mxu0 %vm496_vm1, %v422_v50  ;;  %444 = vst [vmem:[#allocation1 + $0x1] ss:$4 sm:$0xff] %v267_v51 }
  0x59   : > { %445 = vst [vmem:[#allocation1 + $0x2] ss:$4 sm:$0xff] %v344_v56 }
  0x5a   : > { %446 = vst [vmem:[#allocation1 + $0x3] ss:$4 sm:$0xff] %v345_v57  ;;  %v442_v15 = vld.sshfl [vmem:[#allocation1 + $0x20] sm:$0xff pattern:$0x73625140] }
  0x5b   : > { %447 = vst [vmem:[#allocation1 + $0x20] ss:$4 sm:$0xff] %v346_v12 }
  0x5c   : > { %448 = vst [vmem:[#allocation1 + $0x21] ss:$4 sm:$0xff] %v268_v13 }
  0x5d   : > { %449 = vst [vmem:[#allocation1 + $0x22] ss:$4 sm:$0xff] %v269_v60  ;;  %v2373_v60 = vstv %s2085_s10 }
  0x5e   : > { %450 = vst [vmem:[#allocation1 + $0x23] ss:$4 sm:$0xff] %v347_v14  ;;  %vm806_vm4 = vcmp.ge.s32.totalorder %v2373_v60, 1  ;;  %vm816_vm5 = vcmp.le.s32.totalorder %v2373_v60, 16 }
  0x5f   : > { %2099 = vmatmul.msk.f32.gmra.mxu2 %vm496_vm1, %v442_v15  ;;  %vm2383_vm6 = vmand %vm806_vm4, %vm816_vm5 }
  0x60   : > { %2096 = vmatmul.msk.f32.gmra.mxu0 %vm496_vm1, %v431_v47  ;;  %v369_v47 = vrot.slane %v279_v33, 4 }
  0x61   : > { %v451_v1 = vld.sshfl [vmem:[#allocation1] sm:$0xff pattern:$0x73625140] }
  0x62   : > { %453 = vst [vmem:[#allocation1] ss:$4 sm:$0xff] %v348_v62 }
  0x63   : > { %454 = vst [vmem:[#allocation1 + $0x1] ss:$4 sm:$0xff] %v349_v63 }
  0x64   : > { %455 = vst [vmem:[#allocation1 + $0x2] ss:$4 sm:$0xff] %v270_v61 }
  0x65   : > { %456 = vst [vmem:[#allocation1 + $0x3] ss:$4 sm:$0xff] %v350_v0  ;;  %v452_v24 = vld.sshfl [vmem:[#allocation1 + $0x20] sm:$0xff pattern:$0x73625140]  ;;  %v2378_v0 = vshrl.u32 %v802_v59, 7 }
  0x66   : > { %457 = vst [vmem:[#allocation1 + $0x20] ss:$4 sm:$0xff] %v351_v21 }
  0x67   : > { %2100 = vmatmul.msk.f32.gmra.mxu2 %vm496_vm1, %v451_v1  ;;  %458 = vst [vmem:[#allocation1 + $0x21] ss:$4 sm:$0xff] %v352_v22  ;;  %vm836_vm7 = vcmp.ge.s32.totalorder %v2378_v0, 1 }
  0x68   : > { %2097 = vmatmul.msk.f32.gmra.mxu0 %vm496_vm1, %v432_v2  ;;  %459 = vst [vmem:[#allocation1 + $0x22] ss:$4 sm:$0xff] %v271_v23  ;;  %vm839_vm9 = vmand %vm2383_vm6, %vm836_vm7 }
  0x69   : > { %460 = vst [vmem:[#allocation1 + $0x23] ss:$4 sm:$0xff] %v272_v6 }
  0x6c   : > { %v461_v10 = vld.sshfl [vmem:[#allocation1] sm:$0xff pattern:$0x73625140] }
  0x6d   : > { %463 = vst [vmem:[#allocation1] ss:$4 sm:$0xff] %v353_v7 }
  0x6e   : > { %464 = vst [vmem:[#allocation1 + $0x1] ss:$4 sm:$0xff] %v354_v8 }
  0x6f   : > { %465 = vst [vmem:[#allocation1 + $0x2] ss:$4 sm:$0xff] %v355_v9  ;;  %2101 = vmatmul.msk.f32.gmra.mxu2 %vm496_vm1, %v452_v24 }
  0x70   : > { %466 = vst [vmem:[#allocation1 + $0x3] ss:$4 sm:$0xff] %v273_v11  ;;  %v462_v34 = vld.sshfl [vmem:[#allocation1 + $0x20] sm:$0xff pattern:$0x73625140] }
  0x71   : > { %467 = vst [vmem:[#allocation1 + $0x20] ss:$4 sm:$0xff] %v356_v30 }
  0x72   : > { %468 = vst [vmem:[#allocation1 + $0x21] ss:$4 sm:$0xff] %v357_v31 }
  0x73   : > { %469 = vst [vmem:[#allocation1 + $0x22] ss:$4 sm:$0xff] %v358_v32 }
  0x74   : > { %470 = vst [vmem:[#allocation1 + $0x23] ss:$4 sm:$0xff] %v274_v35 }
  0x77   : > { %v471_v20 = vld.sshfl [vmem:[#allocation1] sm:$0xff pattern:$0x73625140]  ;;  %2102 = vmatmul.msk.f32.gmra.mxu2 %vm496_vm1, %v461_v10  ;;  %v2395_v10 = vadd.s32 16, %v2378_v0 }
  0x78   : > { %473 = vst [vmem:[#allocation1] ss:$4 sm:$0xff] %v275_v16 }
  0x79   : > { %474 = vst [vmem:[#allocation1 + $0x1] ss:$4 sm:$0xff] %v359_v17  ;;  %vm871_vm10 = vcmp.le.s32.totalorder %v2395_v10, 16 }
  0x7a   : > { %475 = vst [vmem:[#allocation1 + $0x2] ss:$4 sm:$0xff] %v360_v18  ;;  %vm874_vm14 = vmand %vm2383_vm6, %vm871_vm10 }
  0x7b   : > { %476 = vst [vmem:[#allocation1 + $0x3] ss:$4 sm:$0xff] %v361_v19  ;;  %v472_v43 = vld.sshfl [vmem:[#allocation1 + $0x20] sm:$0xff pattern:$0x73625140] }
  0x7c   : > { %477 = vst [vmem:[#allocation1 + $0x20] ss:$4 sm:$0xff] %v276_v39 }
  0x7d   : > { %478 = vst [vmem:[#allocation1 + $0x21] ss:$4 sm:$0xff] %v362_v40 }
  0x7e   : > { %479 = vst [vmem:[#allocation1 + $0x22] ss:$4 sm:$0xff] %v363_v41 }
  0x7f   : > { %2103 = vmatmul.msk.f32.gmra.mxu2 %vm496_vm1, %v462_v34  ;;  %480 = vst [vmem:[#allocation1 + $0x23] ss:$4 sm:$0xff] %v364_v42 }
  0x82   : > { %v2354_v29 = vld.sshfl [vmem:[#allocation1] sm:$0xff pattern:$0x73625140] }
  0x83   : > { %483 = vst [vmem:[#allocation1] ss:$4 sm:$0xff] %v277_v26 }
  0x84   : > { %484 = vst [vmem:[#allocation1 + $0x1] ss:$4 sm:$0xff] %v278_v25 }
  0x85   : > { %485 = vst [vmem:[#allocation1 + $0x2] ss:$4 sm:$0xff] %v365_v27  ;;  %v793_v27 = vadd.s32 1, %v2373_v60 }
  0x86   : > { %486 = vst [vmem:[#allocation1 + $0x3] ss:$4 sm:$0xff] %v366_v28  ;;  %v482_v49 = vld.sshfl [vmem:[#allocation1 + $0x20] sm:$0xff pattern:$0x73625140] }
  0x87   : > { %2104 = vmatmul.msk.f32.gmra.mxu2 %vm496_vm1, %v471_v20  ;;  %487 = vst [vmem:[#allocation1 + $0x20] ss:$4 sm:$0xff] %v367_v45  ;;  %vm807_vm15 = vcmp.ge.s32.totalorder %v793_v27, 1 }
  0x88   : > { %488 = vst [vmem:[#allocation1 + $0x21] ss:$4 sm:$0xff] %v279_v33 }
  0x89   : > { %489 = vst [vmem:[#allocation1 + $0x22] ss:$4 sm:$0xff] %v368_v46 }
  0x8a   : > { %490 = vst [vmem:[#allocation1 + $0x23] ss:$4 sm:$0xff] %v369_v47 }
  0x8d   : > { %v491_v38 = vld.sshfl [vmem:[#allocation1] sm:$0xff pattern:$0x73625140] }
  0x8e   : > { %493 = vst [vmem:[#allocation1] ss:$4 sm:$0xff] %v370_v36  ;;  %2108 = vmatmul.msk.f32.vlgmr.msra.gmra.mxu3 %vm496_vm1, %v491_v38 }
  0x8f   : > { %494 = vst [vmem:[#allocation1 + $0x1] ss:$4 sm:$0xff] %v280_v37  ;;  %2105 = vmatmul.msk.f32.gmra.mxu2 %vm496_vm1, %v472_v43 }
  0x91   : > { %v492_v61 = vld.sshfl [vmem:[#allocation1 + $0x20] sm:$0xff pattern:$0x73625140] }
  0x96   : > { %v495_v51 = vld.sshfl [vmem:[#allocation1] sm:$0xff pattern:$0x73625140]  ;;  %2109 = vmatmul.msk.f32.gmra.mxu3 %vm496_vm1, %v492_v61 }
  0x97   : > { %2106 = vmatmul.msk.f32.gmra.mxu2 %vm496_vm1, %v2354_v29 }
  0x9d   : > { %v564_v48 = vpop.f32.mrf.mxu0 }
  0x9e   : > { %v565_v50 = vadd.f32 %v2367_v44, %v564_v48  ;;  %2110 = vmatmul.msk.f32.gmra.mxu3 %vm496_vm1, %v495_v51 }
  0x9f   : > { %2107 = vmatmul.msk.f32.gmra.mxu2 %vm496_vm1, %v482_v49 }
  0xa0   : > { %vm633_vm2 = vcmp.ge.f32.partialorder %v565_v50, 0.0  ;;  %v656_v52 = vmul.f32 0.1, %v565_v50 }
  0xa2   : > { %v679_v53 = vsel %vm633_vm2, %v565_v50, %v656_v52  ;;  %vm817_vm2 = vcmp.le.s32.totalorder %v793_v27, 16 }
  0xa3   : > { %v725_v54 = vrot.slane %v679_v53, 2  ;;  %v726_v55 = vrot.slane %v679_v53, 4  ;;  %v727_v56 = vrot.slane %v679_v53, 6  ;;  %962 = vst [vmem:[#allocation1] ss:$4 sm:$0xff] %v679_v53  ;;  %vm2421_vm4 = vmand %vm807_vm15, %vm817_vm2 }
  0xa4   : > { %vm842_vm5 = vmand %vm2421_vm4, %vm836_vm7 }
  0xa5   : > { %964 = vst [vmem:[#allocation1 + $0x1] ss:$4 sm:$0xff] %v725_v54  ;;  %v567_v57 = vpop.f32.mrf.mxu0  ;;  %v794_v54 = vadd.s32 2, %v2373_v60 }
  0xa6   : > { %966 = vst [vmem:[#allocation1 + $0x2] ss:$4 sm:$0xff] %v726_v55  ;;  %v568_v58 = vadd.f32 %v2367_v44, %v567_v57 }
  0xa7   : > { %968 = vst [vmem:[#allocation1 + $0x3] ss:$4 sm:$0xff] %v727_v56 }
  0xa8   : > { %vm634_vm3 = vcmp.ge.f32.partialorder %v568_v58, 0.0  ;;  %v657_v62 = vmul.f32 0.1, %v568_v58 }
  0xaa   : > { %v680_v63 = vsel %vm634_vm3, %v568_v58, %v657_v62 }
  0xab   : > { %v728_v1 = vrot.slane %v680_v63, 2  ;;  %v729_v2 = vrot.slane %v680_v63, 4  ;;  %v730_v3 = vrot.slane %v680_v63, 6  ;;  %970 = vst [vmem:[#allocation1 + $0x20] ss:$4 sm:$0xff] %v680_v63 }
  0xad   : > { %972 = vst [vmem:[#allocation1 + $0x21] ss:$4 sm:$0xff] %v728_v1  ;;  %v570_v4 = vpop.f32.mrf.mxu0 }
  0xae   : > { %974 = vst [vmem:[#allocation1 + $0x22] ss:$4 sm:$0xff] %v729_v2  ;;  %v571_v5 = vadd.f32 %v2367_v44, %v570_v4  ;;  %v977_v8 = vld.sshfl [vmem:[#allocation1] sm:$0xff pattern:$0x73625140] }
  0xaf   : > { %976 = vst [vmem:[#allocation1 + $0x23] ss:$4 sm:$0xff] %v730_v3  ;;  %v2397_v13 = vsel %vm839_vm9, %v977_v8, 0.0  ;;  %vm808_vm9 = vcmp.ge.s32.totalorder %v794_v54, 1 }
  0xb0   : > { %vm635_vm8 = vcmp.ge.f32.partialorder %v571_v5, 0.0  ;;  %v658_v7 = vmul.f32 0.1, %v571_v5  ;;  %v1263_v19 = vrot.slane %v2397_v13, 2  ;;  %v1174_v22 = vrot.slane %v2397_v13, 1 }
  0xb2   : > { %v681_v9 = vsel %vm635_vm8, %v571_v5, %v658_v7  ;;  %vm877_vm8 = vmand %vm2421_vm4, %vm871_vm10 }
  0xb3   : > { %v731_v11 = vrot.slane %v681_v9, 2  ;;  %979 = vst [vmem:[#allocation1] ss:$4 sm:$0xff] %v681_v9  ;;  %v732_v12 = vrot.slane %v681_v9, 4  ;;  %v733_v14 = vrot.slane %v681_v9, 6 }
  0xb5   : > { %v573_v15 = vpop.f32.mrf.mxu0 }
  0xb6   : > { %v978_v16 = vld.sshfl [vmem:[#allocation1 + $0x20] sm:$0xff pattern:$0x73625140]  ;;  %v574_v17 = vadd.f32 %v2367_v44, %v573_v15 }
  0xb7   : > { %981 = vst [vmem:[#allocation1 + $0x20] ss:$4 sm:$0xff] %v731_v11  ;;  %v2403_v18 = vsel %vm2383_vm6, %v978_v16, 0.0 }
  0xb8   : > { %982 = vst [vmem:[#allocation1 + $0x21] ss:$4 sm:$0xff] %v732_v12  ;;  %vm636_vm13 = vcmp.ge.f32.partialorder %v574_v17, 0.0  ;;  %v659_v20 = vmul.f32 0.1, %v574_v17  ;;  %v1264_v21 = vrot.slane %v2403_v18, 2 }
  0xb9   : > { %983 = vst [vmem:[#allocation1 + $0x22] ss:$4 sm:$0xff] %v733_v14  ;;  %v1175_v23 = vrot.slane %v2403_v18, 1 }
  0xba   : > { %v980_v24 = vld.sshfl [vmem:[#allocation1] sm:$0xff pattern:$0x73625140]  ;;  %v682_v25 = vsel %vm636_vm13, %v574_v17, %v659_v20  ;;  %v1265_v26 = vsel %vm1262_vm11, %v1263_v19, %v1264_v21  ;;  %vm818_vm13 = vcmp.le.s32.totalorder %v794_v54, 16 }
  0xbb   : > { %v734_v28 = vrot.slane %v682_v25, 2  ;;  %v735_v29 = vrot.slane %v682_v25, 4  ;;  %v736_v30 = vrot.slane %v682_v25, 6  ;;  %984 = vst [vmem:[#allocation1 + $0x23] ss:$4 sm:$0xff] %v682_v25  ;;  %1303 = vrot.lane.b32.xlu1 %v1265_v26, %s2229_s11  ;;  %v1176_v31 = vsel %vm1173_vm12, %v1174_v22, %v1175_v23  ;;  %vm2459_vm15 = vmand %vm808_vm9, %vm818_vm13 }
  0xbc   : > { %1214 = vrot.lane.b32.xlu0 %v1176_v31, %s2230_s12  ;;  %v1121_v32 = vsel %vm874_vm14, %v980_v24, 0.0  ;;  %vm845_vm2 = vmand %vm2459_vm15, %vm836_vm7 }
  0xbd   : > { %986 = vst [vmem:[#allocation1] ss:$4 sm:$0xff] %v734_v28  ;;  %v576_v33 = vpop.f32.mrf.mxu0  ;;  %v1266_v34 = vrot.slane %v1121_v32, 2  ;;  %v1177_v37 = vrot.slane %v1121_v32, 1 }
  0xbe   : > { %987 = vst [vmem:[#allocation1 + $0x1] ss:$4 sm:$0xff] %v735_v29  ;;  %v577_v35 = vadd.f32 %v2367_v44, %v576_v33 }
  0xbf   : > { %988 = vst [vmem:[#allocation1 + $0x2] ss:$4 sm:$0xff] %v736_v30  ;;  %v1267_v36 = vsel %vm1262_vm11, %v1264_v21, %v1266_v34  ;;  %v1178_v42 = vsel %vm1173_vm12, %v1175_v23, %v1177_v37 }
  0xc0   : > { %vm637_vm3 = vcmp.ge.f32.partialorder %v577_v35, 0.0  ;;  %v660_v38 = vmul.f32 0.1, %v577_v35  ;;  %1305 = vrot.lane.b32.xlu2 %v1267_v36, %s2229_s11 }
  0xc2   : > { %v683_v40 = vsel %vm637_vm3, %v577_v35, %v660_v38  ;;  %v985_v43 = vld.sshfl [vmem:[#allocation1 + $0x20] sm:$0xff pattern:$0x73625140] }
  0xc3   : > { %v737_v41 = vrot.slane %v683_v40, 2  ;;  %989 = vst [vmem:[#allocation1 + $0x3] ss:$4 sm:$0xff] %v683_v40  ;;  %v2432_v47 = vsel %vm842_vm5, %v985_v43, 0.0  ;;  %v738_v49 = vrot.slane %v683_v40, 4  ;;  %v739_v50 = vrot.slane %v683_v40, 6  ;;  %vm880_vm5 = vmand %vm2459_vm15, %vm871_vm10 }
  0xc4   : > { %1216 = vrot.lane.b32.xlu0 %v1178_v42, %s2230_s12  ;;  %v1179_v53 = vrot.slane %v2432_v47, 1  ;;  %v1268_v7 = vrot.slane %v2432_v47, 2 }
  0xc5   : > { %990 = vst [vmem:[#allocation1 + $0x20] ss:$4 sm:$0xff] %v737_v41  ;;  %v579_v45 = vpop.f32.mrf.mxu0 }
  0xc6   : > { %v580_v46 = vadd.f32 %v2367_v44, %v579_v45 }
  0xc8   : > { %vm638_vm6 = vcmp.ge.f32.partialorder %v580_v46, 0.0  ;;  %v661_v48 = vmul.f32 0.1, %v580_v46  ;;  %1353 = vrot.lane.b32.xlu2 %v2432_v47, %s2231_s13 }
  0xca   : > { %v991_v51 = vld.sshfl [vmem:[#allocation1] sm:$0xff pattern:$0x73625140]  ;;  %v684_v52 = vsel %vm638_vm6, %v580_v46, %v661_v48 }
  0xcb   : > { %993 = vst [vmem:[#allocation1] ss:$4 sm:$0xff] %v738_v49  ;;  %v740_v55 = vrot.slane %v684_v52, 2  ;;  %v741_v56 = vrot.slane %v684_v52, 4  ;;  %v742_v57 = vrot.slane %v684_v52, 6  ;;  %v2444_v58 = vsel %vm2421_vm4, %v991_v51, 0.0 }
  0xcc   : > { %v992_v59 = vld.sshfl [vmem:[#allocation1 + $0x20] sm:$0xff pattern:$0x73625140]  ;;  %994 = vst [vmem:[#allocation1 + $0x1] ss:$4 sm:$0xff] %v739_v50  ;;  %1355 = vrot.lane.b32.xlu0 %v2444_v58, %s2231_s13  ;;  %v1180_v61 = vrot.slane %v2444_v58, 1 }
  0xcd   : > { %995 = vst [vmem:[#allocation1 + $0x2] ss:$4 sm:$0xff] %v684_v52  ;;  %v582_v62 = vpop.f32.mrf.mxu0  ;;  %v2449_v63 = vsel %vm877_vm8, %v992_v59, 0.0  ;;  %v1269_v4 = vrot.slane %v2444_v58, 2  ;;  %v795_v52 = vadd.s32 3, %v2373_v60 }
  0xce   : > { %996 = vst [vmem:[#allocation1 + $0x3] ss:$4 sm:$0xff] %v740_v55  ;;  %v583_v1 = vadd.f32 %v2367_v44, %v582_v62  ;;  %v1181_v2 = vsel %vm1173_vm12, %v1179_v53, %v1180_v61  ;;  %v1182_v3 = vrot.slane %v2449_v63, 1  ;;  %v1271_v30 = vrot.slane %v2449_v63, 2 }
  0xcf   : > { %997 = vst [vmem:[#allocation1 + $0x20] ss:$4 sm:$0xff] %v741_v56  ;;  %1218 = vrot.lane.b32.xlu1 %v1181_v2, %s2230_s12  ;;  %v1270_v14 = vsel %vm1262_vm11, %v1268_v7, %v1269_v4  ;;  %vm809_vm6 = vcmp.ge.s32.totalorder %v795_v52, 1  ;;  %vm819_vm8 = vcmp.le.s32.totalorder %v795_v52, 16 }
  0xd0   : > { %998 = vst [vmem:[#allocation1 + $0x21] ss:$4 sm:$0xff] %v742_v57  ;;  %vm639_vm14 = vcmp.ge.f32.partialorder %v583_v1, 0.0  ;;  %v662_v5 = vmul.f32 0.1, %v583_v1  ;;  %v1183_v6 = vsel %vm1173_vm12, %v1180_v61, %v1182_v3  ;;  %v1272_v36 = vsel %vm1262_vm11, %v1269_v4, %v1271_v30  ;;  %vm2515_vm13 = vmand %vm809_vm6, %vm819_vm8 }
  0xd1   : > { %1409 = vrot.lane.b32.xlu2 %v1183_v6, %s2232_s14 }
  0xd2   : > { %v685_v8 = vsel %vm639_vm14, %v583_v1, %v662_v5  ;;  %vm883_vm14 = vmand %vm2515_vm13, %vm871_vm10 }
  0xd3   : > { %v743_v11 = vrot.slane %v685_v8, 2  ;;  %v744_v12 = vrot.slane %v685_v8, 4  ;;  %999 = vst [vmem:[#allocation1 + $0x22] ss:$4 sm:$0xff] %v685_v8  ;;  %v745_v21 = vrot.slane %v685_v8, 6 }
  0xd4   : > { %1307 = vrot.lane.b32.xlu0 %v1270_v14, %s2229_s11 }
  0xd5   : > { %v1001_v15 = vld.sshfl [vmem:[#allocation1] sm:$0xff pattern:$0x73625140]  ;;  %1000 = vst [vmem:[#allocation1 + $0x23] ss:$4 sm:$0xff] %v743_v11  ;;  %v585_v16 = vpop.f32.mrf.mxu0 }
  0xd6   : > { %1003 = vst [vmem:[#allocation1] ss:$4 sm:$0xff] %v744_v12  ;;  %v586_v17 = vadd.f32 %v2367_v44, %v585_v16  ;;  %v2471_v20 = vsel %vm845_vm2, %v1001_v15, 0.0  ;;  %vm848_vm2 = vmand %vm2515_vm13, %vm836_vm7 }
  0xd7   : > { %1460 = vrot.lane.b32.xlu1 %v1270_v14, %s2233_s15  ;;  %v1184_v45 = vrot.slane %v2471_v20, 1  ;;  %v1273_v48 = vrot.slane %v2471_v20, 2 }
  0xd8   : > { %vm640_vm3 = vcmp.ge.f32.partialorder %v586_v17, 0.0  ;;  %v663_v19 = vmul.f32 0.1, %v586_v17 }
  0xd9   : > { %1510 = vrot.lane.b32.xlu2 %v2471_v20, %s2234_s16 }
  0xda   : > { %v686_v22 = vsel %vm640_vm3, %v586_v17, %v663_v19  ;;  %v594_v59 = vpop.f32.mrf.mxu2 }
  0xdb   : > { %v746_v23 = vrot.slane %v686_v22, 2  ;;  %v747_v25 = vrot.slane %v686_v22, 4  ;;  %v748_v26 = vrot.slane %v686_v22, 6 }
  0xdc   : > { %v1002_v24 = vld.sshfl [vmem:[#allocation1 + $0x20] sm:$0xff pattern:$0x73625140]  ;;  %1407 = vrot.lane.b32.xlu0 %v1181_v2, %s2232_s14  ;;  %v595_v2 = vadd.f32 %v2367_v44, %v594_v59 }
  0xdd   : > { %1005 = vst [vmem:[#allocation1 + $0x20] ss:$4 sm:$0xff] %v745_v21  ;;  %v588_v27 = vpop.f32.mrf.mxu0  ;;  %v1004_v29 = vld.sshfl [vmem:[#allocation1] sm:$0xff pattern:$0x73625140]  ;;  %v2481_v32 = vsel %vm2459_vm15, %v1002_v24, 0.0 }
  0xde   : > { %1006 = vst [vmem:[#allocation1 + $0x21] ss:$4 sm:$0xff] %v686_v22  ;;  %v589_v28 = vadd.f32 %v2367_v44, %v588_v27  ;;  %v1127_v38 = vsel %vm880_vm5, %v1004_v29, 0.0  ;;  %v1274_v40 = vrot.slane %v2481_v32, 2  ;;  %v1185_v43 = vrot.slane %v2481_v32, 1 }
  0xdf   : > { %1007 = vst [vmem:[#allocation1 + $0x22] ss:$4 sm:$0xff] %v746_v23  ;;  %1220 = vrot.lane.b32.xlu1 %v1183_v6, %s2230_s12  ;;  %v1276_v41 = vrot.slane %v1127_v38, 2  ;;  %v1187_v49 = vrot.slane %v1127_v38, 1  ;;  %vm643_vm15 = vcmp.ge.f32.partialorder %v595_v2, 0.0 }
  0xe0   : > { %1008 = vst [vmem:[#allocation1 + $0x23] ss:$4 sm:$0xff] %v747_v25  ;;  %vm641_vm4 = vcmp.ge.f32.partialorder %v589_v28, 0.0  ;;  %v664_v31 = vmul.f32 0.1, %v589_v28  ;;  %v1186_v46 = vsel %vm1173_vm12, %v1184_v45, %v1185_v43  ;;  %v1275_v50 = vsel %vm1262_vm11, %v1273_v48, %v1274_v40 }
  0xe1   : > { %1010 = vst [vmem:[#allocation1] ss:$4 sm:$0xff] %v748_v26  ;;  %1359 = vrot.lane.b32.xlu2 %v2481_v32, %s2231_s13  ;;  %v1277_v42 = vsel %vm1262_vm11, %v1274_v40, %v1276_v41  ;;  %v1188_v51 = vsel %vm1173_vm12, %v1185_v43, %v1187_v49  ;;  %v666_v4 = vmul.f32 0.1, %v595_v2  ;;  %v796_v43 = vadd.s32 4, %v2373_v60 }
  0xe2   : > { %v687_v33 = vsel %vm641_vm4, %v589_v28, %v664_v31  ;;  %v597_v17 = vpop.f32.mrf.mxu2 }
  0xe3   : > { %v749_v34 = vrot.slane %v687_v33, 2  ;;  %v750_v35 = vrot.slane %v687_v33, 4  ;;  %1011 = vst [vmem:[#allocation1 + $0x1] ss:$4 sm:$0xff] %v687_v33  ;;  %v751_v37 = vrot.slane %v687_v33, 6  ;;  %v689_v6 = vsel %vm643_vm15, %v595_v2, %v666_v4 }
  0xe4   : > { %1462 = vrot.lane.b32.xlu0 %v1272_v36, %s2233_s15  ;;  %v755_v7 = vrot.slane %v689_v6, 2  ;;  %v756_v8 = vrot.slane %v689_v6, 4  ;;  %v757_v9 = vrot.slane %v689_v6, 6  ;;  %v598_v19 = vadd.f32 %v2367_v44, %v597_v17 }
  0xe5   : > { %1012 = vst [vmem:[#allocation1 + $0x2] ss:$4 sm:$0xff] %v749_v34  ;;  %v591_v53 = vpop.f32.mrf.mxu0  ;;  %vm810_vm6 = vcmp.ge.s32.totalorder %v796_v43, 1  ;;  %vm820_vm8 = vcmp.le.s32.totalorder %v796_v43, 16 }
  0xe6   : > { %1013 = vst [vmem:[#allocation1 + $0x3] ss:$4 sm:$0xff] %v750_v35  ;;  %v592_v54 = vadd.f32 %v2367_v44, %v591_v53  ;;  %vm644_vm3 = vcmp.ge.f32.partialorder %v598_v19, 0.0  ;;  %v667_v21 = vmul.f32 0.1, %v598_v19 }
  0xe7   : > { %v1009_v39 = vld.sshfl [vmem:[#allocation1 + $0x20] sm:$0xff pattern:$0x73625140]  ;;  %1309 = vrot.lane.b32.xlu1 %v1272_v36, %s2229_s11 }
  0xe8   : > { %1014 = vst [vmem:[#allocation1 + $0x20] ss:$4 sm:$0xff] %v751_v37  ;;  %vm642_vm9 = vcmp.ge.f32.partialorder %v592_v54, 0.0  ;;  %v665_v55 = vmul.f32 0.1, %v592_v54  ;;  %v2530_v11 = vsel %vm848_vm2, %v1009_v39, 0.0  ;;  %v690_v25 = vsel %vm644_vm3, %v598_v19, %v667_v21 }
  0xe9   : > { %1512 = vrot.lane.b32.xlu2 %v2481_v32, %s2234_s16  ;;  %v1189_v22 = vrot.slane %v2530_v11, 1  ;;  %v758_v26 = vrot.slane %v690_v25, 2  ;;  %v759_v27 = vrot.slane %v690_v25, 4  ;;  %v760_v28 = vrot.slane %v690_v25, 6 }
  0xea   : > { %v688_v57 = vsel %vm642_vm9, %v592_v54, %v665_v55  ;;  %v600_v31 = vpop.f32.mrf.mxu2  ;;  %v1278_v52 = vrot.slane %v2530_v11, 2  ;;  %vm2576_vm9 = vmand %vm810_vm6, %vm820_vm8  ;;  %vm1681_vm2 = vcmask 64512  }
  0xeb   : > { %v752_v62 = vrot.slane %v688_v57, 2  ;;  %v753_v63 = vrot.slane %v688_v57, 4  ;;  %v754_v1 = vrot.slane %v688_v57, 6  ;;  %v601_v33 = vadd.f32 %v2367_v44, %v600_v31 }
  0xec   : > { %1313 = vrot.lane.b32.xlu0 %v1277_v42, %s2229_s11 }
  0xed   : > { %v1015_v56 = vld.sshfl [vmem:[#allocation1] sm:$0xff pattern:$0x73625140]  ;;  %vm645_vm4 = vcmp.ge.f32.partialorder %v601_v33, 0.0  ;;  %v668_v35 = vmul.f32 0.1, %v601_v33 }
  0xee   : > { %1017 = vst [vmem:[#allocation1] ss:$4 sm:$0xff] %v688_v57  ;;  %v2534_v12 = vsel %vm2515_vm13, %v1015_v56, 0.0  ;;  %vm851_vm13 = vmand %vm2576_vm9, %vm836_vm7 }
  0xef   : > { %1357 = vrot.lane.b32.xlu1 %v2471_v20, %s2231_s13  ;;  %v1016_v3 = vld.sshfl [vmem:[#allocation1 + $0x20] sm:$0xff pattern:$0x73625140]  ;;  %1018 = vst [vmem:[#allocation1 + $0x1] ss:$4 sm:$0xff] %v752_v62  ;;  %v1279_v15 = vrot.slane %v2534_v12, 2  ;;  %v691_v36 = vsel %vm645_vm4, %v601_v33, %v668_v35 }
  0xf0   : > { %1019 = vst [vmem:[#allocation1 + $0x2] ss:$4 sm:$0xff] %v753_v63  ;;  %v1130_v5 = vsel %vm883_vm14, %v1016_v3, 0.0  ;;  %v1190_v23 = vrot.slane %v2534_v12, 1  ;;  %v761_v37 = vrot.slane %v691_v36, 2  ;;  %v762_v38 = vrot.slane %v691_v36, 4 }
  0xf1   : > { %1222 = vrot.lane.b32.xlu2 %v1186_v46, %s2230_s12  ;;  %1020 = vst [vmem:[#allocation1 + $0x3] ss:$4 sm:$0xff] %v754_v1  ;;  %v1281_v14 = vrot.slane %v1130_v5, 2  ;;  %v763_v39 = vrot.slane %v691_v36, 6  ;;  %v1192_v40 = vrot.slane %v1130_v5, 1  ;;  %v1280_v56 = vsel %vm1262_vm11, %v1278_v52, %v1279_v15  ;;  %v1800_v52 = vld [vmem:[%s3387_s3] sm:$0xff] }
  0xf2   : > { %1021 = vst [vmem:[#allocation1 + $0x20] ss:$4 sm:$0xff] %v689_v6  ;;  %v1191_v30 = vsel %vm1173_vm12, %v1189_v22, %v1190_v23  ;;  %v1804_v33 = vld [vmem:[%s3387_s3 + $0x20] sm:$0xf] }
  0xf3   : > { %1022 = vst [vmem:[#allocation1 + $0x21] ss:$4 sm:$0xff] %v755_v7  ;;  %v2543_v16 = vsel %vm1262_vm11, %v1279_v15, %v1281_v14  ;;  %v1193_v48 = vsel %vm1173_vm12, %v1190_v23, %v1192_v40  ;;  %2111 = vmatpush.msk.msra.mxu1 %vm543_vm0, %v1804_v33  ;;  %2132 = vmatpush.msk.msrb.mxu3 %vm543_vm0, %v1804_v33  ;;  %vm886_vm0 = vmand %vm2576_vm9, %vm871_vm10 }
  0xf4   : > { %1564 = vrot.lane.b32.xlu0 %v1186_v46, %s2235_s17  ;;  %1023 = vst [vmem:[#allocation1 + $0x22] ss:$4 sm:$0xff] %v756_v8 }
  0xf5   : > { %1024 = vst [vmem:[#allocation1 + $0x23] ss:$4 sm:$0xff] %v757_v9 }
  0xf7   : > { %1617 = vrot.lane.b32.xlu1 %v1275_v50, %s2236_s25 }
  0xf8   : > { %v1025_v24 = vld.sshfl [vmem:[#allocation1] sm:$0xff pattern:$0x73625140] }
  0xf9   : > { %1224 = vrot.lane.b32.xlu2 %v1188_v51, %s2230_s12  ;;  %1027 = vst [vmem:[#allocation1] ss:$4 sm:$0xff] %v690_v25  ;;  %v2595_v59 = vsel %vm851_vm13, %v1025_v24, 0.0 }
  0xfa   : > { %v1194_v22 = vrot.slane %v2595_v59, 1 }
  0xfc   : > { %1619 = vrot.lane.b32.xlu0 %v1277_v42, %s2236_s25  ;;  %v2554_v29 = vld.sshfl [vmem:[#allocation1 + $0x20] sm:$0xff pattern:$0x73625140] }
  0xfd   : > { %1029 = vst [vmem:[#allocation1 + $0x20] ss:$4 sm:$0xff] %v758_v26  ;;  %v2618_v19 = vsel %vm2576_vm9, %v2554_v29, 0.0 }
  0xfe   : > { %1030 = vst [vmem:[#allocation1 + $0x21] ss:$4 sm:$0xff] %v759_v27  ;;  %v1195_v23 = vrot.slane %v2618_v19, 1 }
  0xff   : > { %1566 = vrot.lane.b32.xlu1 %v1188_v51, %s2235_s17  ;;  %1031 = vst [vmem:[#allocation1 + $0x22] ss:$4 sm:$0xff] %v760_v28 }
 0x100   : > { %1032 = vst [vmem:[#allocation1 + $0x23] ss:$4 sm:$0xff] %v691_v36  ;;  %v2564_v41 = vld.sshfl [vmem:[#allocation1] sm:$0xff pattern:$0x73625140]  ;;  %v1196_v28 = vsel %vm1173_vm12, %v1194_v22, %v1195_v23  ;;  %v1803_v36 = vld [vmem:[%s3387_s3 + $0x18] sm:$0xff] }
 0x101   : > { %1311 = vrot.lane.b32.xlu2 %v1275_v50, %s2229_s11  ;;  %1034 = vst [vmem:[#allocation1] ss:$4 sm:$0xff] %v761_v37  ;;  %1873 = vmatpush.msra.mxu1 %v1803_v36 }
 0x102   : > { %1035 = vst [vmem:[#allocation1 + $0x1] ss:$4 sm:$0xff] %v762_v38  ;;  %v1284_v38 = vrot.slane %v2618_v19, 2  ;;  %2133 = vmatpush.msrb.mxu3 %v1803_v36 }
 0x103   : > { %1036 = vst [vmem:[#allocation1 + $0x2] ss:$4 sm:$0xff] %v763_v39  ;;  %v1802_v39 = vld [vmem:[%s3387_s3 + $0x10] sm:$0xff] }
 0x104   : > { %1411 = vrot.lane.b32.xlu0 %v1186_v46, %s2232_s14  ;;  %1874 = vmatpush.msra.mxu1 %v1802_v39 }
 0x105   : > { %2134 = vmatpush.msrb.mxu3 %v1802_v39 }
 0x107   : > { %1464 = vrot.lane.b32.xlu1 %v1275_v50, %s2233_s15  ;;  %v2581_v54 = vld.sshfl [vmem:[#allocation1 + $0x20] sm:$0xff pattern:$0x73625140] }
 0x109   : > { %1466 = vrot.lane.b32.xlu2 %v1277_v42, %s2233_s15  ;;  %v603_v42 = vpop.f32.mrf.mxu2 }
 0x10a   : > { %v604_v45 = vadd.f32 %v2367_v44, %v603_v42 }
 0x10c   : > { %1361 = vrot.lane.b32.xlu0 %v2530_v11, %s2231_s13  ;;  %vm646_vm5 = vcmp.ge.f32.partialorder %v604_v45, 0.0  ;;  %v669_v49 = vmul.f32 0.1, %v604_v45 }
 0x10e   : > { %v692_v50 = vsel %vm646_vm5, %v604_v45, %v669_v49  ;;  %v1801_v45 = vld [vmem:[%s3387_s3 + $0x8] sm:$0xff] }
 0x10f   : > { %1413 = vrot.lane.b32.xlu1 %v1188_v51, %s2232_s14  ;;  %v764_v51 = vrot.slane %v692_v50, 2  ;;  %1037 = vst [vmem:[#allocation1 + $0x3] ss:$4 sm:$0xff] %v692_v50  ;;  %v765_v61 = vrot.slane %v692_v50, 4  ;;  %v766_v62 = vrot.slane %v692_v50, 6  ;;  %v2674_v50 = vsel %vm886_vm0, %v2564_v41, 0.0  ;;  %1875 = vmatpush.msra.mxu1 %v1801_v45 }
 0x110   : > { %2135 = vmatpush.msrb.mxu3 %v1801_v45  ;;  %vm1732_vm0 = vcmask 162816  }
 0x111   : > { %1317 = vrot.lane.b32.xlu2 %v2543_v16, %s2229_s11  ;;  %1038 = vst [vmem:[#allocation1 + $0x20] ss:$4 sm:$0xff] %v764_v51  ;;  %v606_v63 = vpop.f32.mrf.mxu2  ;;  %v797_v51 = vadd.s32 5, %v2373_v60  ;;  %1876 = vmatpush.msra.mxu1 %v1800_v52 }
 0x112   : > { %v607_v1 = vadd.f32 %v2367_v44, %v606_v63  ;;  %2136 = vmatpush.msrb.mxu3 %v1800_v52 }
 0x113   : > { %vm811_vm3 = vcmp.ge.s32.totalorder %v797_v51, 1  ;;  %vm821_vm4 = vcmp.le.s32.totalorder %v797_v51, 16 }
 0x114   : > { %1514 = vrot.lane.b32.xlu0 %v2530_v11, %s2234_s16  ;;  %vm647_vm14 = vcmp.ge.f32.partialorder %v607_v1, 0.0  ;;  %v670_v4 = vmul.f32 0.1, %v607_v1  ;;  %vm2693_vm6 = vmand %vm811_vm3, %vm821_vm4  ;;  %vm1749_vm3 = vcmask 195584   ;;  %vm3390_vm4 = vcmask 228352  }
 0x115   : > { %vm854_vm8 = vmand %vm2693_vm6, %vm836_vm7 }
 0x116   : > { %v2601_v2 = vld.sshfl [vmem:[#allocation1] sm:$0xff pattern:$0x73625140]  ;;  %v693_v5 = vsel %vm647_vm14, %v607_v1, %v670_v4  ;;  %vm889_vm9 = vmand %vm2693_vm6, %vm871_vm10  ;;  %vm1698_vm14 = vcmask 97280  }
 0x117   : > { %1363 = vrot.lane.b32.xlu1 %v2534_v12, %s2231_s13  ;;  %1041 = vst [vmem:[#allocation1] ss:$4 sm:$0xff] %v765_v61  ;;  %v767_v7 = vrot.slane %v693_v5, 2  ;;  %v768_v8 = vrot.slane %v693_v5, 4  ;;  %v769_v9 = vrot.slane %v693_v5, 6 }
 0x118   : > { %1042 = vst [vmem:[#allocation1 + $0x1] ss:$4 sm:$0xff] %v766_v62  ;;  %v2609_v15 = vld.sshfl [vmem:[#allocation1 + $0x20] sm:$0xff pattern:$0x73625140]  ;;  %v1197_v62 = vrot.slane %v2674_v50, 1 }
 0x119   : > { %1568 = vrot.lane.b32.xlu2 %v1191_v30, %s2235_s17  ;;  %1043 = vst [vmem:[#allocation1 + $0x2] ss:$4 sm:$0xff] %v693_v5  ;;  %v609_v14 = vpop.f32.mrf.mxu2  ;;  %v1136_v36 = vsel %vm889_vm9, %v2609_v15, 0.0 }
 0x11a   : > { %v2559_v34 = vpop.permute.xlu2 %1305  ;;  %1044 = vst [vmem:[#allocation1 + $0x3] ss:$4 sm:$0xff] %v767_v7  ;;  %v610_v21 = vadd.f32 %v2367_v44, %v609_v14  ;;  %v2691_v4 = vsel %vm1173_vm12, %v1195_v23, %v1197_v62  ;;  %v1291_v52 = vrot.slane %v1136_v36, 2 }
 0x11b   : > { %1045 = vst [vmem:[#allocation1 + $0x20] ss:$4 sm:$0xff] %v768_v8 }
 0x11c   : > { %1226 = vrot.lane.b32.xlu0 %v1191_v30, %s2230_s12  ;;  %1046 = vst [vmem:[#allocation1 + $0x21] ss:$4 sm:$0xff] %v769_v9  ;;  %vm648_vm15 = vcmp.ge.f32.partialorder %v610_v21, 0.0  ;;  %v671_v25 = vmul.f32 0.1, %v610_v21 }
 0x11e   : > { %v694_v26 = vsel %vm648_vm15, %v610_v21, %v671_v25  ;;  %vm1715_vm15 = vcmask 130048  }
 0x11f   : > { %1516 = vrot.lane.b32.xlu1 %v2534_v12, %s2234_s16  ;;  %v770_v29 = vrot.slane %v694_v26, 2  ;;  %1047 = vst [vmem:[#allocation1 + $0x22] ss:$4 sm:$0xff] %v694_v26 }
 0x121   : > { %1623 = vrot.lane.b32.xlu2 %v2543_v16, %s2236_s25  ;;  %1048 = vst [vmem:[#allocation1 + $0x23] ss:$4 sm:$0xff] %v770_v29  ;;  %v2644_v37 = vld.sshfl [vmem:[#allocation1] sm:$0xff pattern:$0x73625140]  ;;  %v2710_v29 = vsel %vm854_vm8, %v2581_v54, 0.0 }
 0x122   : > { %v2570_v46 = vpop.permute.xlu2 %1353 }
 0x124   : > { %1570 = vrot.lane.b32.xlu0 %v1193_v48, %s2235_s17 }
 0x127   : > { %1228 = vrot.lane.b32.xlu1 %v1193_v48, %s2230_s12 }
 0x128   : > { %v2680_v61 = vld.sshfl [vmem:[#allocation1 + $0x20] sm:$0xff pattern:$0x73625140] }
 0x129   : > { %1415 = vrot.lane.b32.xlu2 %v1191_v30, %s2232_s14  ;;  %v771_v30 = vrot.slane %v694_v26, 4 }
 0x12b   : > { %v2583_v55 = vpop.permute.xlu2 %1409  ;;  %1051 = vst [vmem:[#allocation1] ss:$4 sm:$0xff] %v771_v30 }
 0x12c   : > { %1468 = vrot.lane.b32.xlu0 %v1280_v56, %s2233_s15 }
 0x12d   : > { %v2611_v17 = vpop.permute.xlu1 %1303 }
 0x12e   : > { %v2593_v57 = vpop.permute.xlu0 %1214 }
 0x12f   : > { %1315 = vrot.lane.b32.xlu1 %v1280_v56, %s2229_s11 }
 0x131   : > { %1365 = vrot.lane.b32.xlu2 %v2595_v59, %s2231_s13 }
 0x133   : > { %v2603_v3 = vpop.permute.xlu2 %1510 }
 0x134   : > { %1417 = vrot.lane.b32.xlu0 %v1193_v48, %s2232_s14  ;;  %v772_v48 = vrot.slane %v694_v26, 6  ;;  %v2705_v26 = vld.sshfl [vmem:[#allocation1] sm:$0xff pattern:$0x73625140] }
 0x136   : > { %v2606_v6 = vpop.permute.xlu0 %1216  ;;  %1053 = vst [vmem:[#allocation1 + $0x20] ss:$4 sm:$0xff] %v772_v48  ;;  %v1202_v48 = vrot.slane %v1136_v36, 1 }
 0x137   : > { %1621 = vrot.lane.b32.xlu1 %v1280_v56, %s2236_s25  ;;  %v612_v56 = vpop.f32.mrf.mxu2 }
 0x138   : > { %v613_v41 = vadd.f32 %v2367_v44, %v612_v56 }
 0x139   : > { %1518 = vrot.lane.b32.xlu2 %v2595_v59, %s2234_s16 }
 0x13a   : > { %vm649_vm5 = vcmp.ge.f32.partialorder %v613_v41, 0.0  ;;  %v672_v1 = vmul.f32 0.1, %v613_v41 }
 0x13b   : > { %v2623_v24 = vpop.permute.xlu2 %1359 }
 0x13c   : > { %1367 = vrot.lane.b32.xlu0 %v2618_v19, %s2231_s13  ;;  %v695_v7 = vsel %vm649_vm5, %v613_v41, %v672_v1  ;;  %v1286_v41 = vrot.slane %v2674_v50, 2  ;;  %vm1783_vm5 = vcmask 261120  }
 0x13d   : > { %v773_v9 = vrot.slane %v695_v7, 2  ;;  %v774_v14 = vrot.slane %v695_v7, 4  ;;  %v775_v21 = vrot.slane %v695_v7, 6  ;;  %1054 = vst [vmem:[#allocation1 + $0x21] ss:$4 sm:$0xff] %v695_v7 }
 0x13e   : > { %v2627_v27 = vpop.permute.xlu0 %1355 }
 0x13f   : > { %1470 = vrot.lane.b32.xlu1 %v2543_v16, %s2233_s15  ;;  %v1283_v16 = vrot.slane %v2595_v59, 2  ;;  %v615_v23 = vpop.f32.mrf.mxu2  ;;  %1055 = vst [vmem:[#allocation1 + $0x22] ss:$4 sm:$0xff] %v773_v9 }
 0x140   : > { %v616_v25 = vadd.f32 %v2367_v44, %v615_v23  ;;  %1056 = vst [vmem:[#allocation1 + $0x23] ss:$4 sm:$0xff] %v774_v14  ;;  %v2721_v44 = vsel %vm2693_vm6, %v2601_v2, 0.0  ;;  %v1665_v2 = vsel %vm496_vm1, %v2397_v13, %v2593_v57  ;;  %vm3391_vm6 = vcmask 293888  }
 0x141   : > { %v1219_v31 = vpop.permute.xlu1 %1218  ;;  %1230 = vrot.lane.b32.xlu2 %v1196_v28, %s2230_s12  ;;  %1058 = vst [vmem:[#allocation1] ss:$4 sm:$0xff] %v775_v21  ;;  %v1682_v13 = vsel %vm1681_vm2, %v1665_v2, %v2611_v17  ;;  %v1289_v51 = vrot.slane %v2721_v44, 2 }
 0x142   : > { %v1667_v40 = vsel %vm496_vm1, %v2432_v47, %v1219_v31  ;;  %v1285_v47 = vsel %vm1262_vm11, %v1283_v16, %v1284_v38  ;;  %vm650_vm13 = vcmp.ge.f32.partialorder %v616_v25, 0.0  ;;  %v673_v30 = vmul.f32 0.1, %v616_v25 }
 0x143   : > { %v2638_v35 = vpop.permute.xlu2 %1512  ;;  %v1699_v56 = vsel %vm1698_vm14, %v1682_v13, %v2570_v46  ;;  %v2771_v5 = vsel %vm1262_vm11, %v1289_v51, %v1291_v52  ;;  %v1288_v46 = vrot.slane %v2710_v29, 2 }
 0x144   : > { %1520 = vrot.lane.b32.xlu0 %v2618_v19, %s2234_s16  ;;  %v696_v31 = vsel %vm650_vm13, %v616_v25, %v673_v30 }
 0x145   : > { %v776_v16 = vrot.slane %v696_v31, 2  ;;  %v777_v39 = vrot.slane %v696_v31, 4  ;;  %1059 = vst [vmem:[#allocation1 + $0x1] ss:$4 sm:$0xff] %v696_v31  ;;  %v778_v7 = vrot.slane %v696_v31, 6  ;;  %v2791_v14 = vsel %vm1262_vm11, %v1288_v46, %v1289_v51 }
 0x146   : > { %v1308_v42 = vpop.permute.xlu0 %1307 }
 0x147   : > { %v2661_v43 = vsel %vm1681_vm2, %v1667_v40, %v1308_v42  ;;  %1572 = vrot.lane.b32.xlu1 %v1196_v28, %s2235_s17  ;;  %1060 = vst [vmem:[#allocation1 + $0x2] ss:$4 sm:$0xff] %v776_v16  ;;  %v1057_v9 = vld.sshfl [vmem:[#allocation1 + $0x20] sm:$0xff pattern:$0x73625140]  ;;  %v618_v52 = vpop.f32.mrf.mxu2 }
 0x148   : > { %1061 = vst [vmem:[#allocation1 + $0x3] ss:$4 sm:$0xff] %v777_v39 }
 0x149   : > { %v2670_v49 = vpop.permute.xlu1 %1460  ;;  %1472 = vrot.lane.b32.xlu2 %v1285_v47, %s2233_s15  ;;  %1062 = vst [vmem:[#allocation1 + $0x20] ss:$4 sm:$0xff] %v778_v7 }
 0x14b   : > { %v1223_v53 = vpop.permute.xlu2 %1222 }
 0x14c   : > { %1319 = vrot.lane.b32.xlu0 %v1285_v47, %s2229_s11  ;;  %v1669_v42 = vsel %vm496_vm1, %v2471_v20, %v1223_v53 }
 0x14e   : > { %v2685_v63 = vpop.permute.xlu0 %1407 }
 0x14f   : > { %1419 = vrot.lane.b32.xlu1 %v1196_v28, %s2232_s14 }
 0x151   : > { %v1221_v8 = vpop.permute.xlu1 %1220  ;;  %1574 = vrot.lane.b32.xlu2 %v2691_v4, %s2235_s17 }
 0x152   : > { %v1668_v54 = vsel %vm496_vm1, %v2444_v58, %v1221_v8  ;;  %v2784_v8 = vsel %vm1262_vm11, %v1284_v38, %v1286_v41 }
 0x153   : > { %v1225_v22 = vpop.permute.xlu2 %1224 }
 0x154   : > { %1625 = vrot.lane.b32.xlu0 %v1285_v47, %s2236_s25  ;;  %v1200_v47 = vrot.slane %v2721_v44, 1  ;;  %v1670_v20 = vsel %vm496_vm1, %v2481_v32, %v1225_v22  ;;  %v1716_v32 = vsel %vm1715_vm15, %v1699_v56, %v2685_v63 }
 0x155   : > { %v1733_v63 = vsel %vm1732_vm0, %v1716_v32, %v2670_v49 }
 0x156   : > { %v2707_v28 = vpop.permute.xlu0 %1462  ;;  %v2755_v53 = vsel %vm1173_vm12, %v1200_v47, %v1202_v48  ;;  %v1750_v49 = vsel %vm1749_vm3, %v1733_v63, %v2603_v3 }
 0x157   : > { %1369 = vrot.lane.b32.xlu1 %v2710_v29, %s2231_s13 }
 0x159   : > { %v1310_v33 = vpop.permute.xlu1 %1309  ;;  %1371 = vrot.lane.b32.xlu2 %v2721_v44, %s2231_s13 }
 0x15a   : > { %v1685_v40 = vsel %vm1681_vm2, %v1668_v54, %v1310_v33 }
 0x15b   : > { %v1312_v58 = vpop.permute.xlu2 %1311  ;;  %v2736_v45 = vsel %vm1698_vm14, %v1685_v40, %v2623_v24 }
 0x15c   : > { %v2739_v15 = vsel %vm1681_vm2, %v1669_v42, %v1312_v58  ;;  %1232 = vrot.lane.b32.xlu0 %v2691_v4, %s2230_s12  ;;  %v799_v58 = vadd.s32 7, %v2373_v60 }
 0x15e   : > { %v1314_v57 = vpop.permute.xlu0 %1313 }
 0x15f   : > { %v2749_v24 = vsel %vm1681_vm2, %v1670_v20, %v1314_v57  ;;  %1522 = vrot.lane.b32.xlu1 %v2710_v29, %s2234_s16 }
 0x161   : > { %v1358_v17 = vpop.permute.xlu1 %1357  ;;  %1236 = vrot.lane.b32.xlu2 %v2755_v53, %s2230_s12 }
 0x162   : > { %v2765_v62 = vsel %vm1698_vm14, %v2661_v43, %v1358_v17  ;;  %v1666_v43 = vsel %vm496_vm1, %v2403_v18, %v2606_v6  ;;  %v2897_v17 = vld [vmem:[%s3386_s2] ss:$0 sm:$0xff] }
 0x163   : > { %v2768_v1 = vpop.permute.xlu2 %1466  ;;  %v1683_v18 = vsel %vm1681_vm2, %v1666_v43, %v2559_v34  ;;  %v798_v34 = vadd.s32 6, %v2373_v60  ;;  %v619_v32 = vadd.f32 %v2897_v17, %v618_v52 }
 0x164   : > { %1325 = vrot.lane.b32.xlu0 %v2771_v5, %s2229_s11  ;;  %v1700_v21 = vsel %vm1698_vm14, %v1683_v18, %v2627_v27  ;;  %v1199_v27 = vrot.slane %v2710_v29, 1  ;;  %v1063_v18 = vld.sshfl [vmem:[#allocation1] sm:$0xff pattern:$0x73625140] }
 0x165   : > { %v1717_v23 = vsel %vm1715_vm15, %v1700_v21, %v2583_v55  ;;  %vm812_vm8 = vcmp.ge.s32.totalorder %v798_v34, 1  ;;  %vm822_vm9 = vcmp.le.s32.totalorder %v798_v34, 16 }
 0x166   : > { %v1565_v50 = vpop.permute.xlu0 %1564  ;;  %v1734_v25 = vsel %vm1732_vm0, %v1717_v23, %v2707_v28  ;;  %v2823_v36 = vsel %vm1173_vm12, %v1199_v27, %v1200_v47  ;;  %vm2825_vm13 = vmand %vm812_vm8, %vm822_vm9  ;;  %vm823_vm8 = vcmp.le.s32.totalorder %v799_v58, 16  ;;  %v621_v23 = vpop.f32.mrf.mxu2 }
 0x167   : > { %1321 = vrot.lane.b32.xlu1 %v2784_v8, %s2229_s11  ;;  %v1767_v6 = vsel %vm3390_vm4, %v1750_v49, %v1565_v50  ;;  %v1751_v31 = vsel %vm1749_vm3, %v1734_v25, %v2638_v35  ;;  %v2843_v39 = vsel %vm2825_vm13, %v2680_v61, 0.0  ;;  %v674_v50 = vmul.f32 0.1, %v619_v32 }
 0x168   : > { %v1205_v61 = vrot.slane %v2843_v39, 1  ;;  %v1294_v43 = vrot.slane %v2843_v39, 2 }
 0x169   : > { %v1618_v38 = vpop.permute.xlu1 %1617  ;;  %1323 = vrot.lane.b32.xlu2 %v2791_v14, %s2229_s11 }
 0x16a   : > { %v1784_v22 = vsel %vm1783_vm5, %v1767_v6, %v1618_v38 }
 0x16b   : > { %2112 = vmatmul.msk.f32.vlgmr.msra.gmra.mxu1 %vm3391_vm6, %v1784_v22  ;;  %v2802_v3 = vpop.permute.xlu2 %1317 }
 0x16c   : > { %1478 = vrot.lane.b32.xlu0 %v2771_v5, %s2233_s15 }
 0x16e   : > { %v1620_v30 = vpop.permute.xlu0 %1619 }
 0x16f   : > { %1627 = vrot.lane.b32.xlu1 %v2784_v8, %s2236_s25 }
 0x171   : > { %v1567_v54 = vpop.permute.xlu1 %1566  ;;  %1629 = vrot.lane.b32.xlu2 %v2791_v14, %s2236_s25 }
 0x172   : > { %v1768_v55 = vsel %vm3390_vm4, %v1751_v31, %v1567_v54  ;;  %vm857_vm4 = vmand %vm2825_vm13, %vm836_vm7 }
 0x173   : > { %v2819_v33 = vpop.permute.xlu2 %1568  ;;  %v1785_v28 = vsel %vm1783_vm5, %v1768_v55, %v1620_v30  ;;  %v2850_v2 = vsel %vm857_vm4, %v2644_v37, 0.0  ;;  %vm813_vm4 = vcmp.ge.s32.totalorder %v799_v58, 1  ;;  %v622_v30 = vadd.f32 %v2897_v17, %v621_v23 }
 0x174   : > { %2113 = vmatmul.msk.f32.gmra.mxu1 %vm3391_vm6, %v1785_v28  ;;  %1576 = vrot.lane.b32.xlu0 %v2823_v36, %s2235_s17  ;;  %v1204_v47 = vrot.slane %v2850_v2, 1  ;;  %vm2872_vm9 = vmand %vm813_vm4, %vm823_vm8  ;;  %v1293_v46 = vrot.slane %v2850_v2, 2  ;;  %v1064_v28 = vld.sshfl [vmem:[#allocation1 + $0x20] sm:$0xff pattern:$0x73625140] }
 0x175   : > { %vm860_vm6 = vmand %vm2872_vm9, %vm836_vm7  ;;  %v675_v31 = vmul.f32 0.1, %v622_v30 }
 0x176   : > { %v2832_v35 = vpop.permute.xlu0 %1411  ;;  %v2866_v37 = vsel %vm1173_vm12, %v1204_v47, %v1205_v61  ;;  %vm892_vm4 = vmand %vm2825_vm13, %vm871_vm10  ;;  %v2892_v56 = vsel %vm860_vm6, %v1057_v9, 0.0  ;;  %vm651_vm6 = vcmp.ge.f32.partialorder %v619_v32, 0.0  ;;  %vm652_vm13 = vcmp.ge.f32.partialorder %v622_v30, 0.0 }
 0x177   : > { %1234 = vrot.lane.b32.xlu1 %v2823_v36, %s2230_s12  ;;  %v1139_v7 = vsel %vm892_vm4, %v2705_v26, 0.0  ;;  %v697_v6 = vsel %vm651_vm6, %v619_v32, %v674_v50  ;;  %v698_v16 = vsel %vm652_vm13, %v622_v30, %v675_v31  ;;  %vm895_vm8 = vmand %vm2872_vm9, %vm871_vm10  ;;  %vm3408_vm6 = vcmask 228352  }
 0x178   : > { %v1296_v49 = vrot.slane %v1139_v7, 2  ;;  %v779_v38 = vrot.slane %v697_v6, 2  ;;  %v780_v21 = vrot.slane %v697_v6, 4  ;;  %v781_v22 = vrot.slane %v697_v6, 6  ;;  %1065 = vst [vmem:[#allocation1] ss:$4 sm:$0xff] %v697_v6 }
 0x179   : > { %v2845_v40 = vpop.permute.xlu1 %1464  ;;  %1528 = vrot.lane.b32.xlu2 %v2843_v39, %s2234_s16  ;;  %v1207_v34 = vrot.slane %v1139_v7, 1  ;;  %v782_v58 = vrot.slane %v698_v16, 2  ;;  %v783_v47 = vrot.slane %v698_v16, 4  ;;  %1069 = vst [vmem:[#allocation1 + $0x20] ss:$4 sm:$0xff] %v698_v16  ;;  %v2942_v7 = vsel %vm2872_vm9, %v1063_v18, 0.0 }
 0x17a   : > { %1066 = vst [vmem:[#allocation1 + $0x1] ss:$4 sm:$0xff] %v779_v38  ;;  %v1297_v25 = vsel %vm1262_vm11, %v1294_v43, %v1296_v49  ;;  %v2951_v49 = vsel %vm895_vm8, %v1064_v28, 0.0  ;;  %vm3409_vm13 = vcmask 293888  }
 0x17b   : > { %v2852_v42 = vpop.permute.xlu2 %1623  ;;  %1067 = vst [vmem:[#allocation1 + $0x2] ss:$4 sm:$0xff] %v780_v21  ;;  %v1208_v55 = vsel %vm1173_vm12, %v1205_v61, %v1207_v34  ;;  %v1212_v57 = vrot.slane %v2951_v49, 1  ;;  %v1210_v34 = vrot.slane %v2942_v7, 1 }
 0x17c   : > { %1373 = vrot.lane.b32.xlu0 %v2850_v2, %s2231_s13  ;;  %1068 = vst [vmem:[#allocation1 + $0x3] ss:$4 sm:$0xff] %v781_v22 }
 0x17d   : > { %1070 = vst [vmem:[#allocation1 + $0x21] ss:$4 sm:$0xff] %v782_v58  ;;  %v2969_v58 = vsel %vm1173_vm12, %v1210_v34, %v1212_v57 }
 0x17e   : > { %v1362_v48 = vpop.permute.xlu0 %1361  ;;  %1071 = vst [vmem:[#allocation1 + $0x22] ss:$4 sm:$0xff] %v783_v47 }
 0x17f   : > { %v2861_v13 = vsel %vm1698_vm14, %v2739_v15, %v1362_v48  ;;  %1425 = vrot.lane.b32.xlu1 %v2755_v53, %s2232_s14  ;;  %v784_v48 = vrot.slane %v698_v16, 6 }
 0x181   : > { %v2868_v20 = vpop.permute.xlu1 %1413  ;;  %1427 = vrot.lane.b32.xlu2 %v2866_v37, %s2232_s14  ;;  %1072 = vst [vmem:[#allocation1 + $0x23] ss:$4 sm:$0xff] %v784_v48 }
 0x183   : > { %v2876_v51 = vpop.permute.xlu2 %1415 }
 0x184   : > { %1238 = vrot.lane.b32.xlu0 %v2866_v37, %s2230_s12 }
 0x186   : > { %v2884_v15 = vpop.permute.xlu0 %1514 }
 0x187   : > { %1375 = vrot.lane.b32.xlu1 %v2843_v39, %s2231_s13 }
 0x188   : > { %v2964_v31 = vld.sshfl [vmem:[#allocation1 + $0x20] sm:$0xff pattern:$0x73625140] }
 0x189   : > { %v1364_v41 = vpop.permute.xlu1 %1363  ;;  %1377 = vrot.lane.b32.xlu2 %v2892_v56, %s2231_s13 }
 0x18a   : > { %v2906_v63 = vsel %vm1698_vm14, %v2749_v24, %v1364_v41  ;;  %v2914_v24 = vsel %vm1262_vm11, %v1293_v46, %v1294_v43  ;;  %v624_v41 = vpop.f32.mrf.mxu3 }
 0x18b   : > { %v2909_v9 = vpop.permute.xlu2 %1365  ;;  %v625_v50 = vadd.f32 %v2897_v17, %v624_v41  ;;  %v2984_v41 = vld.sshfl [vmem:[#allocation1] sm:$0xff pattern:$0x73625140] }
 0x18c   : > { %1530 = vrot.lane.b32.xlu0 %v2892_v56, %s2234_s16 }
 0x18d   : > { %vm653_vm4 = vcmp.ge.f32.partialorder %v625_v50, 0.0 }
 0x18e   : > { %v1227_v26 = vpop.permute.xlu0 %1226 }
 0x18f   : > { %1327 = vrot.lane.b32.xlu1 %v2914_v24, %s2229_s11 }
 0x191   : > { %v2920_v27 = vpop.permute.xlu1 %1516  ;;  %1329 = vrot.lane.b32.xlu2 %v1297_v25, %s2229_s11 }
 0x192   : > { %v627_v28 = vpop.f32.mrf.mxu3 }
 0x193   : > { %v2923_v54 = vpop.permute.xlu2 %1518 }
 0x194   : > { %1429 = vrot.lane.b32.xlu0 %v1208_v55, %s2232_s14 }
 0x196   : > { %v2927_v52 = vpop.permute.xlu0 %1570 }
 0x197   : > { %1480 = vrot.lane.b32.xlu1 %v2914_v24, %s2233_s15 }
 0x199   : > { %v1229_v32 = vpop.permute.xlu1 %1228  ;;  %1635 = vrot.lane.b32.xlu2 %v1297_v25, %s2236_s25 }
 0x19a   : > { %v1672_v61 = vsel %vm496_vm1, %v2534_v12, %v1229_v32  ;;  %v676_v12 = vmul.f32 0.1, %v625_v50 }
 0x19b   : > { %v2938_v46 = vpop.permute.xlu2 %1230  ;;  %v2946_v43 = vsel %vm1681_vm2, %v1672_v61, %v2802_v3  ;;  %v1671_v3 = vsel %vm496_vm1, %v2530_v11, %v1227_v26  ;;  %v628_v11 = vadd.f32 %v2897_v17, %v627_v28  ;;  %v1718_v26 = vsel %vm1715_vm15, %v2765_v62, %v2832_v35 }
 0x19c   : > { %1379 = vrot.lane.b32.xlu0 %v2942_v7, %s2231_s13  ;;  %v699_v18 = vsel %vm653_vm4, %v625_v50, %v676_v12  ;;  %v1735_v47 = vsel %vm1732_vm0, %v1718_v26, %v2845_v40  ;;  %v1298_v62 = vrot.slane %v2892_v56, 2  ;;  %v1299_v35 = vrot.slane %v2942_v7, 2  ;;  %vm3410_vm4 = vmmov %vm3408_vm6 }
 0x19d   : > { %v785_v38 = vrot.slane %v699_v18, 2  ;;  %v786_v21 = vrot.slane %v699_v18, 4  ;;  %v787_v23 = vrot.slane %v699_v18, 6  ;;  %vm654_vm9 = vcmp.ge.f32.partialorder %v628_v11, 0.0  ;;  %1075 = vst [vmem:[#allocation1] ss:$4 sm:$0xff] %v699_v18 }
 0x19e   : > { %v2953_v6 = vpop.permute.xlu0 %1468  ;;  %v677_v48 = vmul.f32 0.1, %v628_v11  ;;  %v1752_v32 = vsel %vm1749_vm3, %v1735_v47, %v2884_v15 }
 0x19f   : > { %1240 = vrot.lane.b32.xlu1 %v1208_v55, %s2230_s12  ;;  %1077 = vst [vmem:[#allocation1 + $0x20] ss:$4 sm:$0xff] %v785_v38  ;;  %v1769_v15 = vsel %vm3408_vm6, %v1752_v32, %v2819_v33  ;;  %v630_v38 = vpop.f32.mrf.mxu3 }
 0x1a0   : > { %1078 = vst [vmem:[#allocation1 + $0x21] ss:$4 sm:$0xff] %v786_v21  ;;  %v700_v50 = vsel %vm654_vm9, %v628_v11, %v677_v48  ;;  %v1300_v21 = vsel %vm1262_vm11, %v1298_v62, %v1299_v35  ;;  %vm3411_vm9 = vmmov %vm3409_vm13  ;;  %v800_v48 = vadd.s32 8, %v2373_v60 }
 0x1a1   : > { %v1316_v22 = vpop.permute.xlu1 %1315  ;;  %1482 = vrot.lane.b32.xlu2 %v1297_v25, %s2233_s15  ;;  %v1209_v25 = vrot.slane %v2892_v56, 1  ;;  %1079 = vst [vmem:[#allocation1 + $0x22] ss:$4 sm:$0xff] %v787_v23  ;;  %v790_v28 = vrot.slane %v700_v50, 6 }
 0x1a2   : > { %v2962_v30 = vsel %vm1681_vm2, %v1671_v3, %v1316_v22  ;;  %1080 = vst [vmem:[#allocation1 + $0x23] ss:$4 sm:$0xff] %v700_v50  ;;  %v631_v3 = vadd.f32 %v2897_v17, %v630_v38  ;;  %v788_v22 = vrot.slane %v700_v50, 2  ;;  %vm814_vm6 = vcmp.ge.s32.totalorder %v800_v48, 1 }
 0x1a3   : > { %v2966_v16 = vpop.permute.xlu2 %1472  ;;  %v2990_v40 = vsel %vm1173_vm12, %v1209_v25, %v1210_v34  ;;  %v789_v34 = vrot.slane %v700_v50, 4  ;;  %v1720_v38 = vsel %vm1715_vm15, %v2861_v13, %v2876_v51 }
 0x1a4   : > { %1244 = vrot.lane.b32.xlu0 %v2969_v58, %s2230_s12  ;;  %vm655_vm8 = vcmp.ge.f32.partialorder %v631_v3, 0.0 }
 0x1a6   : > { %v2982_v61 = vpop.permute.xlu0 %1417 }
 0x1a7   : > { %1582 = vrot.lane.b32.xlu1 %v1208_v55, %s2235_s17  ;;  %v1719_v55 = vsel %vm1715_vm15, %v2736_v45, %v2868_v20  ;;  %v678_v45 = vmul.f32 0.1, %v631_v3 }
 0x1a8   : > { %v1736_v33 = vsel %vm1732_vm0, %v1719_v55, %v2768_v1  ;;  %v3018_v1 = vld.sshfl [vmem:[#allocation1] sm:$0xff pattern:$0x73625140] }
 0x1a9   : > { %v1622_v12 = vpop.permute.xlu1 %1621  ;;  %1242 = vrot.lane.b32.xlu2 %v2990_v40, %s2230_s12  ;;  %v1753_v20 = vsel %vm1749_vm3, %v1736_v33, %v2920_v27  ;;  %v701_v26 = vsel %vm655_vm8, %v631_v3, %v678_v45  ;;  %1082 = vst [vmem:[#allocation1] ss:$4 sm:$0xff] %v788_v22  ;;  %v3032_v32 = vld.sshfl [vmem:[#allocation1 + $0x20] sm:$0xff pattern:$0x73625140] }
 0x1aa   : > { %v1786_v57 = vsel %vm1783_vm5, %v1769_v15, %v1622_v12  ;;  %v1770_v11 = vsel %vm3410_vm4, %v1753_v20, %v2927_v52  ;;  %1083 = vst [vmem:[#allocation1 + $0x1] ss:$4 sm:$0xff] %v789_v34  ;;  %v1301_v52 = vrot.slane %v2951_v49, 2  ;;  %v801_v20 = vadd.s32 9, %v2373_v60 }
 0x1ab   : > { %2114 = vmatmul.msk.f32.gmra.mxu1 %vm3409_vm13, %v1786_v57  ;;  %v3001_v18 = vpop.permute.xlu2 %1574  ;;  %v1787_v27 = vsel %vm1783_vm5, %v1770_v11, %v2852_v42  ;;  %1084 = vst [vmem:[#allocation1 + $0x2] ss:$4 sm:$0xff] %v790_v28  ;;  %vm824_vm13 = vcmp.le.s32.totalorder %v800_v48, 16 }
 0x1ac   : > { %1331 = vrot.lane.b32.xlu0 %v1300_v21, %s2229_s11  ;;  %1085 = vst [vmem:[#allocation1 + $0x3] ss:$4 sm:$0xff] %v701_v26  ;;  %v1302_v50 = vsel %vm1262_vm11, %v1299_v35, %v1301_v52  ;;  %vm3040_vm8 = vmand %vm814_vm6, %vm824_vm13  ;;  %v1673_v35 = vsel %vm496_vm1, %v2595_v59, %v2938_v46  ;;  %v1737_v59 = vsel %vm1732_vm0, %v1720_v38, %v2953_v6  ;;  %vm3415_vm6 = vcmask 293888  }
 0x1ad   : > { %v3052_v55 = vsel %vm3040_vm8, %v2964_v31, 0.0  ;;  %vm863_vm4 = vmand %vm3040_vm8, %vm836_vm7  ;;  %v1754_v13 = vsel %vm1749_vm3, %v1737_v59, %v2923_v54 }
 0x1ae   : > { %v1368_v23 = vpop.permute.xlu0 %1367  ;;  %v1403_v45 = vrot.slane %v3052_v55, 1  ;;  %vm898_vm13 = vmand %vm3040_vm8, %vm871_vm10 }
 0x1af   : > { %v3014_v17 = vsel %vm1698_vm14, %v2946_v43, %v1368_v23  ;;  %1532 = vrot.lane.b32.xlu1 %v2942_v7, %s2234_s16  ;;  %v791_v43 = vrot.slane %v701_v26, 2  ;;  %v1145_v60 = vsel %vm898_vm13, %v3018_v1, 0.0  ;;  %vm3419_vm13 = vcmask 293888  }
 0x1b0   : > { %v1405_v0 = vrot.slane %v1145_v60, 1 }
 0x1b1   : > { %v3020_v25 = vpop.permute.xlu1 %1470  ;;  %1584 = vrot.lane.b32.xlu2 %v2990_v40, %s2235_s17  ;;  %1086 = vst [vmem:[#allocation1 + $0x20] ss:$4 sm:$0xff] %v791_v43 }
 0x1b3   : > { %2115 = vmatmul.msk.f32.gmra.mxu1 %vm3411_vm9, %v1787_v27  ;;  %v3028_v47 = vpop.permute.xlu2 %1371  ;;  %vm3414_vm9 = vcmask 228352   ;;  %v1087_v1 = vld.sshfl [vmem:[#allocation1] sm:$0xff pattern:$0x73625140] }
 0x1b4   : > { %1637 = vrot.lane.b32.xlu0 %v1300_v21, %s2236_s25 }
 0x1b6   : > { %v3034_v62 = vpop.permute.xlu0 %1520 }
 0x1b7   : > { %1333 = vrot.lane.b32.xlu1 %v1302_v50, %s2229_s11  ;;  %s2082_s11 = sshll.u32 %s2211_s18, 4  ;;  %s2083_s18 = sshll.u32 %s3450_s19, 5 }
 0x1b8   : > { %p241_p6 = scmp.lt.s32.totalorder %s2082_s11, 31 }
 0x1b9   : > { %v1573_v42 = vpop.permute.xlu1 %1572  ;;  %1433 = vrot.lane.b32.xlu2 %v2969_v58, %s2232_s14 }
 0x1ba   : > { %v1771_v51 = vsel %vm3414_vm9, %v1754_v13, %v1573_v42  ;;  %vm825_vm9 = vcmp.le.s32.totalorder %v801_v20, 16  ;;  %s3452_s11 = smov (!%p241_p6, %s2082_s11), 31 }
 0x1bb   : > { %v1237_v49 = vpop.permute.xlu2 %1236  ;;  %s244_s12 = sadd.s32 %s2083_s18, %s3452_s11 }
 0x1bc   : > { %1586 = vrot.lane.b32.xlu0 %v2969_v58, %s2235_s17  ;;  %v1143_v58 = vsel %vm863_vm4, %v2984_v41, 0.0  ;;  %v1456_v41 = vrot.slane %v3052_v55, 2  ;;  %vm815_vm4 = vcmp.ge.s32.totalorder %v801_v20, 1  ;;  %v1676_v27 = vsel %vm496_vm1, %v2721_v44, %v1237_v49  ;;  %s2084_s19 = sshll.u32 %s244_s12, 3 }
 0x1bd   : > { %v1455_v54 = vrot.slane %v1143_v58, 2  ;;  %s3183_s6 = scalar_lea.vmem %s3389_s5, %s2084_s19 }
 0x1be   : > { %v1320_v15 = vpop.permute.xlu0 %1319 }
 0x1bf   : > { %v1690_v57 = vsel %vm1681_vm2, %v1673_v35, %v1320_v15  ;;  %1639 = vrot.lane.b32.xlu1 %v1302_v50, %s2236_s25  ;;  %v1457_v23 = vsel %vm1262_vm11, %v1455_v54, %v1456_v41 }
 0x1c1   : > { %v3059_v3 = vpop.permute.xlu1 %1419  ;;  %1383 = vrot.lane.b32.xlu2 %v3052_v55, %s2231_s13 }
 0x1c3   : > { %v3065_v46 = vpop.permute.xlu2 %1323 }
 0x1c4   : > { %1484 = vrot.lane.b32.xlu0 %v1300_v21, %s2233_s15 }
 0x1c6   : > { %v1626_v31 = vpop.permute.xlu0 %1625 }
 0x1c7   : > { %1431 = vrot.lane.b32.xlu1 %v2990_v40, %s2232_s14  ;;  %v1788_v6 = vsel %vm1783_vm5, %v1771_v51, %v1626_v31  ;;  %v1402_v40 = vrot.slane %v1143_v58, 1  ;;  %v1705_v51 = vsel %vm1698_vm14, %v2962_v30, %v2909_v9 }
 0x1c8   : > { %2116 = vmatmul.msk.f32.gmra.mxu1 %vm3415_vm6, %v1788_v6  ;;  %vm3105_vm6 = vmand %vm815_vm4, %vm825_vm9 }
 0x1c9   : > { %v1370_v22 = vpop.permute.xlu1 %1369  ;;  %1534 = vrot.lane.b32.xlu2 %v1143_v58, %s2234_s16  ;;  %v1404_v26 = vsel %vm1173_vm12, %v1402_v40, %v1403_v45  ;;  %vm866_vm8 = vmand %vm3105_vm6, %vm836_vm7  ;;  %v3136_v38 = vsel %vm3105_vm6, %v1087_v1, 0.0  ;;  %vm3418_vm7 = vcmask 228352  }
 0x1ca   : > { %v3082_v21 = vsel %vm1698_vm14, %v1690_v57, %v1370_v22  ;;  %v1146_v57 = vsel %vm866_vm8, %v3032_v32, 0.0  ;;  %v1406_v32 = vsel %vm1173_vm12, %v1403_v45, %v1405_v0  ;;  %vm3420_vm4 = vmmov %vm3418_vm7  ;;  %v1613_v20 = vrot.slane %v3136_v38, 2 }
 0x1cb   : > { %v3084_v33 = vpop.permute.xlu2 %1629  ;;  %v1612_v45 = vrot.slane %v1146_v57, 2  ;;  %vm3421_vm8 = vmmov %vm3419_vm13 }
 0x1cc   : > { %1536 = vrot.lane.b32.xlu0 %v3052_v55, %s2234_s16 }
 0x1ce   : > { %v1233_v34 = vpop.permute.xlu0 %1232 }
 0x1cf   : > { %1486 = vrot.lane.b32.xlu1 %v1302_v50, %s2233_s15  ;;  %v1458_v50 = vrot.slane %v1145_v60, 2  ;;  %v1674_v42 = vsel %vm496_vm1, %v2618_v19, %v1233_v34  ;;  %v1721_v19 = vsel %vm1715_vm15, %v2906_v63, %v2982_v61  ;;  %v1559_v63 = vrot.slane %v1146_v57, 1 }
 0x1d0   : > { %v1738_v59 = vsel %vm1732_vm0, %v1721_v19, %v3020_v25  ;;  %v1560_v61 = vrot.slane %v3136_v38, 1 }
 0x1d1   : > { %v1523_v28 = vpop.permute.xlu1 %1522  ;;  %1641 = vrot.lane.b32.xlu2 %v1457_v23, %s2236_s25  ;;  %v1459_v15 = vsel %vm1262_vm11, %v1456_v41, %v1458_v50 }
 0x1d2   : > { %v1561_v6 = vsel %vm1173_vm12, %v1559_v63, %v1560_v61 }
 0x1d3   : > { %v3098_v11 = vpop.permute.xlu2 %1528 }
 0x1d4   : > { %1435 = vrot.lane.b32.xlu0 %v1404_v26, %s2232_s14 }
 0x1d6   : > { %v1326_v52 = vpop.permute.xlu0 %1325 }
 0x1d7   : > { %v3110_v48 = vsel %vm1681_vm2, %v1676_v27, %v1326_v52  ;;  %1381 = vrot.lane.b32.xlu1 %v1143_v58, %s2231_s13 }
 0x1d9   : > { %v1322_v12 = vpop.permute.xlu1 %1321  ;;  %1488 = vrot.lane.b32.xlu2 %v1457_v23, %s2233_s15 }
 0x1da   : > { %v1691_v49 = vsel %vm1681_vm2, %v1674_v42, %v1322_v12  ;;  %v1088_v12 = vld.sshfl [vmem:[#allocation1 + $0x20] sm:$0xff pattern:$0x73625140] }
 0x1db   : > { %v3122_v35 = vpop.permute.xlu2 %1427  ;;  %v3127_v55 = vsel %vm1698_vm14, %v1691_v49, %v3028_v47  ;;  %v1755_v47 = vsel %vm1749_vm3, %v1738_v59, %v3034_v62  ;;  %v1722_v62 = vsel %vm1715_vm15, %v1705_v51, %v3059_v3 }
 0x1dc   : > { %1643 = vrot.lane.b32.xlu0 %v1459_v15, %s2236_s25  ;;  %v1772_v25 = vsel %vm3418_vm7, %v1755_v47, %v3001_v18  ;;  %v1739_v30 = vsel %vm1732_vm0, %v1722_v62, %v2966_v16  ;;  %v3167_v18 = vld [vmem:[%s3388_s4] ss:$0 sm:$0xff] }
 0x1dd   : > { %v1756_v3 = vsel %vm1749_vm3, %v1739_v30, %v1523_v28 }
 0x1de   : > { %v3142_v13 = vpop.permute.xlu0 %1478 }
 0x1df   : > { %1588 = vrot.lane.b32.xlu1 %v1404_v26, %s2235_s17  ;;  %v1614_v26 = vsel %vm1262_vm11, %v1612_v45, %v1613_v20 }
 0x1e1   : > { %v1628_v31 = vpop.permute.xlu1 %1627  ;;  %1590 = vrot.lane.b32.xlu2 %v1406_v32, %s2235_s17 }
 0x1e2   : > { %v1789_v58 = vsel %vm1783_vm5, %v1772_v25, %v1628_v31 }
 0x1e3   : > { %2117 = vmatmul.msk.f32.gmra.mxu1 %vm3419_vm13, %v1789_v58  ;;  %v1378_v9 = vpop.permute.xlu2 %1377  ;;  %vm901_vm13 = vmand %vm3105_vm6, %vm871_vm10 }
 0x1e4   : > { %1592 = vrot.lane.b32.xlu0 %v1561_v6, %s2235_s17  ;;  %v1148_v49 = vsel %vm901_vm13, %v1088_v12, 0.0  ;;  %vm3422_vm10 = vmmov %vm3420_vm4 }
 0x1e5   : > { %v1562_v47 = vrot.slane %v1148_v49, 1  ;;  %vm3425_vm6 = vmmov %vm3421_vm8 }
 0x1e6   : > { %v1577_v22 = vpop.permute.xlu0 %1576 }
 0x1e7   : > { %v1773_v54 = vsel %vm3420_vm4, %v1756_v3, %v1577_v22  ;;  %1538 = vrot.lane.b32.xlu1 %v1146_v57, %s2234_s16 }
 0x1e8   : > { %v1878_v41 = vpop.f32.mrf.mxu1  ;;  %v1790_v16 = vsel %vm1783_vm5, %v1773_v54, %v3084_v33 }
 0x1e9   : > { %v1879_v34 = vadd.f32 %v3167_v18, %v1878_v41  ;;  %v3173_v40 = vpop.permute.xlu1 %1234  ;;  %1421 = vrot.lane.b32.xlu2 %v2691_v4, %s2232_s14 }
 0x1eb   : > { %vm1926_vm9 = vcmp.ge.f32.partialorder %v1879_v34, 0.0  ;;  %v1942_v23 = vmul.f32 0.1, %v1879_v34  ;;  %2118 = vmatmul.msk.f32.gmra.mxu1 %vm3421_vm8, %v1790_v16  ;;  %v1330_v33 = vpop.permute.xlu2 %1329 }
 0x1ec   : > { %1474 = vrot.lane.b32.xlu0 %v2784_v8, %s2233_s15 }
 0x1ed   : > { %v1958_v4 = vsel %vm1926_vm9, %v1879_v34, %v1942_v23  ;;  %vm3426_vm9 = vmmov %vm3422_vm10 }
 0x1ee   : > { %1974 = vst.msk [vmem:[%s3183_s6] sm:$0xff] %vm1681_vm2, %v1958_v4  ;;  %v1374_v28 = vpop.permute.xlu0 %1373 }
 0x1ef   : > { %1645 = vrot.lane.b32.xlu1 %v1614_v26, %s2236_s25 }
 0x1f1   : > { %v1881_v60 = vpop.f32.mrf.mxu1  ;;  %v1426_v27 = vpop.permute.xlu1 %1425  ;;  %1524 = vrot.lane.b32.xlu2 %v2721_v44, %s2234_s16 }
 0x1f2   : > { %v1882_v52 = vadd.f32 %v3167_v18, %v1881_v60 }
 0x1f3   : > { %v1636_v1 = vpop.permute.xlu2 %1635 }
 0x1f4   : > { %vm1927_vm7 = vcmp.ge.f32.partialorder %v1882_v52, 0.0  ;;  %v1943_v50 = vmul.f32 0.1, %v1882_v52  ;;  %1490 = vrot.lane.b32.xlu0 %v1459_v15, %s2233_s15  ;;  %v1615_v15 = vrot.slane %v1148_v49, 2 }
 0x1f6   : > { %v1959_v8 = vsel %vm1927_vm7, %v1882_v52, %v1943_v50  ;;  %v1239_v42 = vpop.permute.xlu0 %1238  ;;  %v1616_v10 = vsel %vm1262_vm11, %v1613_v20, %v1615_v15  ;;  %vm3423_vm11 = vmmov %vm3421_vm8 }
 0x1f7   : > { %1975 = vst.msk [vmem:[%s3183_s6 + $0x8] sm:$0xff] %vm1681_vm2, %v1959_v8  ;;  %1437 = vrot.lane.b32.xlu1 %v1406_v32, %s2232_s14  ;;  %v1677_v43 = vsel %vm496_vm1, %v2850_v2, %v1239_v42  ;;  %vm3427_vm7 = vmmov %vm3425_vm6 }
 0x1f9   : > { %v1376_v44 = vpop.permute.xlu1 %1375  ;;  %1540 = vrot.lane.b32.xlu2 %v3136_v38, %s2234_s16 }
 0x1fa   : > { %v1710_v4 = vsel %vm1698_vm14, %v3110_v48, %v1376_v44 }
 0x1fb   : > { %v1483_v57 = vpop.permute.xlu2 %1482 }
 0x1fc   : > { %1631 = vrot.lane.b32.xlu0 %v2771_v5, %s2236_s25 }
 0x1fe   : > { %v1531_v19 = vpop.permute.xlu0 %1530 }
 0x1ff   : > { %1578 = vrot.lane.b32.xlu1 %v2755_v53, %s2235_s17  ;;  %v1563_v53 = vsel %vm1173_vm12, %v1560_v61, %v1562_v47  ;;  %v1725_v61 = vsel %vm1715_vm15, %v3127_v55, %v1426_v27  ;;  %vm3424_vm12 = vmmov %vm3420_vm4 }
 0x200   : > { %v1742_v62 = vsel %vm1732_vm0, %v1725_v61, %v3142_v13 }
 0x201   : > { %v1328_v0 = vpop.permute.xlu1 %1327  ;;  %1647 = vrot.lane.b32.xlu2 %v1616_v10, %s2236_s25 }
 0x202   : > { %v1694_v59 = vsel %vm1681_vm2, %v1677_v43, %v1328_v0 }
 0x203   : > { %v3215_v63 = vsel %vm1698_vm14, %v1694_v59, %v1378_v9  ;;  %v3225_v51 = vpop.permute.xlu2 %1242 }
 0x204   : > { %1423 = vrot.lane.b32.xlu0 %v2823_v36, %s2232_s14 }
 0x206   : > { %v1430_v5 = vpop.permute.xlu0 %1429 }
 0x207   : > { %1594 = vrot.lane.b32.xlu1 %v1563_v53, %s2235_s17 }
 0x209   : > { %v1481_v32 = vpop.permute.xlu1 %1480  ;;  %1526 = vrot.lane.b32.xlu2 %v2850_v2, %s2234_s16 }
 0x20c   : > { %1580 = vrot.lane.b32.xlu0 %v2866_v37, %s2235_s17  ;;  %v1585_v37 = vpop.permute.xlu2 %1584 }
 0x20e   : > { %v1380_v31 = vpop.permute.xlu0 %1379 }
 0x20f   : > { %1476 = vrot.lane.b32.xlu1 %v2791_v14, %s2233_s15  ;;  %v1675_v14 = vsel %vm496_vm1, %v2710_v29, %v3173_v40 }
 0x210   : > { %v1692_v9 = vsel %vm1681_vm2, %v1675_v14, %v3065_v46 }
 0x211   : > { %v1241_v36 = vpop.permute.xlu1 %1240  ;;  %v1709_v30 = vsel %vm1698_vm14, %v1692_v9, %v1374_v28  ;;  %v1727_v28 = vsel %vm1715_vm15, %v1710_v4, %v1430_v5 }
 0x212   : > { %v1678_v38 = vsel %vm496_vm1, %v2843_v39, %v1241_v36  ;;  %v1759_v39 = vsel %vm1749_vm3, %v1742_v62, %v3098_v11  ;;  %v1726_v29 = vsel %vm1715_vm15, %v1709_v30, %v3122_v35  ;;  %v1744_v60 = vsel %vm1732_vm0, %v1727_v28, %v1483_v57 }
 0x213   : > { %v1695_v25 = vsel %vm1681_vm2, %v1678_v38, %v1330_v33  ;;  %v1743_v3 = vsel %vm1732_vm0, %v1726_v29, %v1481_v32 }
 0x214   : > { %v3237_v2 = vsel %vm1698_vm14, %v1695_v25, %v1380_v31  ;;  %v1434_v11 = vpop.permute.xlu2 %1433  ;;  %v1760_v54 = vsel %vm1749_vm3, %v1743_v3, %v1531_v19 }
 0x215   : > { %v1777_v46 = vsel %vm3424_vm12, %v1760_v54, %v1585_v37  ;;  %vm3430_vm12 = vmmov %vm3426_vm9 }
 0x216   : > { %v1245_v58 = vpop.permute.xlu0 %1244 }
 0x217   : > { %1633 = vrot.lane.b32.xlu1 %v2914_v24, %s2236_s25  ;;  %v1680_v16 = vsel %vm496_vm1, %v2942_v7, %v1245_v58  ;;  %v1729_v58 = vsel %vm1715_vm15, %v3237_v2, %v1434_v11 }
 0x219   : > { %v1583_v55 = vpop.permute.xlu1 %1582 }
 0x21a   : > { %v1776_v6 = vsel %vm3422_vm10, %v1759_v39, %v1583_v55  ;;  %vm3428_vm10 = vmmov %vm3426_vm9 }
 0x21b   : > { %v1793_v13 = vsel %vm1783_vm5, %v1776_v6, %v1636_v1 }
 0x21c   : > { %2121 = vmatmul.msk.f32.vlgmr.msrb.gmra.mxu3 %vm3423_vm11, %v1793_v13  ;;  %v3266_v20 = vpop.permute.xlu2 %1383  ;;  %vm3429_vm11 = vmmov %vm3425_vm6 }
 0x21e   : > { %v3254_v24 = vpop.permute.xlu0 %1331 }
 0x221   : > { %v1533_v22 = vpop.permute.xlu1 %1532 }
 0x222   : > { %v1761_v27 = vsel %vm1749_vm3, %v1744_v60, %v1533_v22 }
 0x224   : > { %v1535_v1 = vpop.permute.xlu2 %1534 }
 0x226   : > { %v1638_v41 = vpop.permute.xlu0 %1637 }
 0x227   : > { %v1794_v34 = vsel %vm1783_vm5, %v1777_v46, %v1638_v41 }
 0x228   : > { %v1884_v40 = vpop.f32.mrf.mxu1  ;;  %2122 = vmatmul.msk.f32.gmra.mxu3 %vm3425_vm6, %v1794_v34 }
 0x229   : > { %v1885_v35 = vadd.f32 %v3167_v18, %v1884_v40  ;;  %v1334_v45 = vpop.permute.xlu1 %1333 }
 0x22a   : > { %v3269_v23 = vsel %vm1681_vm2, %v1680_v16, %v1334_v45 }
 0x22b   : > { %vm1928_vm4 = vcmp.ge.f32.partialorder %v1885_v35, 0.0  ;;  %v1944_v33 = vmul.f32 0.1, %v1885_v35 }
 0x22c   : > { %v1642_v19 = vpop.permute.xlu2 %1641 }
 0x22d   : > { %v1960_v26 = vsel %vm1928_vm4, %v1885_v35, %v1944_v33 }
 0x22e   : > { %1976 = vst.msk [vmem:[%s3183_s6 + $0x10] sm:$0xff] %vm1681_vm2, %v1960_v26  ;;  %v1587_v7 = vpop.permute.xlu0 %1586 }
 0x22f   : > { %v1778_v50 = vsel %vm3426_vm9, %v1761_v27, %v1587_v7 }
 0x230   : > { %v1887_v52 = vpop.f32.mrf.mxu1 }
 0x231   : > { %v1888_v8 = vadd.f32 %v3167_v18, %v1887_v52  ;;  %v1640_v42 = vpop.permute.xlu1 %1639 }
 0x232   : > { %v1795_v48 = vsel %vm1783_vm5, %v1778_v50, %v1640_v42  ;;  %v1714_v42 = vsel %vm1698_vm14, %v3269_v23, %v3266_v20 }
 0x233   : > { %vm1929_vm8 = vcmp.ge.f32.partialorder %v1888_v8, 0.0  ;;  %v1945_v12 = vmul.f32 0.1, %v1888_v8  ;;  %2123 = vmatmul.msk.f32.gmra.mxu3 %vm3427_vm7, %v1795_v48 }
 0x234   : > { %v1489_v47 = vpop.permute.xlu2 %1488 }
 0x235   : > { %v1961_v44 = vsel %vm1929_vm8, %v1888_v8, %v1945_v12 }
 0x236   : > { %1977 = vst.msk [vmem:[%s3183_s6 + $0x18] sm:$0xff] %vm1681_vm2, %v1961_v44  ;;  %v1485_v49 = vpop.permute.xlu0 %1484 }
 0x239   : > { %v1432_v15 = vpop.permute.xlu1 %1431 }
 0x23a   : > { %v1728_v31 = vsel %vm1715_vm15, %v3215_v63, %v1432_v15  ;;  %v1679_v63 = vsel %vm496_vm1, %v2892_v56, %v3225_v51  ;;  %vm3431_vm1 = vmmov %vm3426_vm9 }
 0x23b   : > { %v1745_v36 = vsel %vm1732_vm0, %v1728_v31, %v1485_v49  ;;  %v1696_v55 = vsel %vm1681_vm2, %v1679_v63, %v3254_v24  ;;  %vm3432_vm9 = vmmov %vm3425_vm6 }
 0x23c   : > { %v1762_v61 = vsel %vm1749_vm3, %v1745_v36, %v1535_v1  ;;  %v1591_v62 = vpop.permute.xlu2 %1590  ;;  %vm3433_vm7 = vmmov %vm3431_vm1 }
 0x23e   : > { %v1537_v10 = vpop.permute.xlu0 %1536 }
 0x241   : > { %v1487_v43 = vpop.permute.xlu1 %1486 }
 0x242   : > { %v1746_v39 = vsel %vm1732_vm0, %v1729_v58, %v1487_v43 }
 0x243   : > { %v1763_v9 = vsel %vm1749_vm3, %v1746_v39, %v1537_v10 }
 0x244   : > { %v1780_v29 = vsel %vm3430_vm12, %v1763_v9, %v1591_v62  ;;  %v1422_v11 = vpop.permute.xlu2 %1421  ;;  %vm3438_vm12 = vmmov %vm3425_vm6 }
 0x245   : > { %v1890_v0 = vpop.f32.mrf.mxu1  ;;  %v1723_v7 = vsel %vm1715_vm15, %v3014_v17, %v1422_v11 }
 0x246   : > { %v1891_v57 = vadd.f32 %v3167_v18, %v1890_v0  ;;  %v1436_v59 = vpop.permute.xlu0 %1435 }
 0x248   : > { %vm1930_vm13 = vcmp.ge.f32.partialorder %v1891_v57, 0.0  ;;  %v1946_v5 = vmul.f32 0.1, %v1891_v57 }
 0x249   : > { %v1382_v53 = vpop.permute.xlu1 %1381 }
 0x24a   : > { %v1962_v32 = vsel %vm1930_vm13, %v1891_v57, %v1946_v5  ;;  %v1713_v13 = vsel %vm1698_vm14, %v1696_v55, %v1382_v53  ;;  %vm3434_vm13 = vmmov %vm3425_vm6 }
 0x24b   : > { %1978 = vst.msk [vmem:[%s3183_s6 + $0x20] sm:$0xff] %vm1681_vm2, %v1962_v32  ;;  %v1730_v2 = vsel %vm1715_vm15, %v1713_v13, %v1436_v59  ;;  %vm3436_vm14 = vmmov %vm3425_vm6 }
 0x24c   : > { %v1747_v56 = vsel %vm1732_vm0, %v1730_v2, %v1489_v47  ;;  %v1525_v35 = vpop.permute.xlu2 %1524 }
 0x24e   : > { %v1644_v38 = vpop.permute.xlu0 %1643 }
 0x24f   : > { %v1797_v3 = vsel %vm1783_vm5, %v1780_v29, %v1644_v38 }
 0x251   : > { %v1589_v25 = vpop.permute.xlu1 %1588 }
 0x252   : > { %v1779_v37 = vsel %vm3428_vm10, %v1762_v61, %v1589_v25  ;;  %vm3435_vm10 = vmmov %vm3431_vm1 }
 0x253   : > { %v1796_v14 = vsel %vm1783_vm5, %v1779_v37, %v1642_v19 }
 0x254   : > { %2124 = vmatmul.msk.f32.gmra.mxu3 %vm3429_vm11, %v1796_v14  ;;  %v1541_v52 = vpop.permute.xlu2 %1540  ;;  %vm3437_vm11 = vmmov %vm3431_vm1 }
 0x256   : > { %v1593_v6 = vpop.permute.xlu0 %1592 }
 0x259   : > { %v1539_v30 = vpop.permute.xlu1 %1538 }
 0x25a   : > { %v1764_v51 = vsel %vm1749_vm3, %v1747_v56, %v1539_v30 }
 0x25b   : > { %v1781_v41 = vsel %vm3431_vm1, %v1764_v51, %v1593_v6 }
 0x25c   : > { %2125 = vmatmul.msk.f32.gmra.mxu3 %vm3425_vm6, %v1797_v3  ;;  %v1648_v19 = vpop.permute.xlu2 %1647 }
 0x25e   : > { %v1475_v24 = vpop.permute.xlu0 %1474 }
 0x25f   : > { %v1740_v27 = vsel %vm1732_vm0, %v1723_v7, %v1475_v24 }
 0x260   : > { %v1893_v22 = vpop.f32.mrf.mxu1  ;;  %v1757_v8 = vsel %vm1749_vm3, %v1740_v27, %v1525_v35 }
 0x261   : > { %v1894_v54 = vadd.f32 %v3167_v18, %v1893_v22  ;;  %v1646_v46 = vpop.permute.xlu1 %1645 }
 0x262   : > { %v1798_v34 = vsel %vm1783_vm5, %v1781_v41, %v1646_v46 }
 0x263   : > { %vm1931_vm4 = vcmp.ge.f32.partialorder %v1894_v54, 0.0  ;;  %v1947_v40 = vmul.f32 0.1, %v1894_v54 }
 0x264   : > { %2126 = vmatmul.msk.f32.gmra.mxu3 %vm3432_vm9, %v1798_v34  ;;  %v1527_v59 = vpop.permute.xlu2 %1526 }
 0x265   : > { %v1963_v16 = vsel %vm1931_vm4, %v1894_v54, %v1947_v40 }
 0x266   : > { %1979 = vst.msk [vmem:[%s3183_s6 + $0x28] sm:$0xff] %vm1681_vm2, %v1963_v16  ;;  %v1491_v45 = vpop.permute.xlu0 %1490 }
 0x268   : > { %v1896_v4 = vpop.f32.mrf.mxu1 }
 0x269   : > { %v1897_v33 = vadd.f32 %v3167_v18, %v1896_v4  ;;  %v1438_v28 = vpop.permute.xlu1 %1437 }
 0x26a   : > { %v1731_v1 = vsel %vm1715_vm15, %v1714_v42, %v1438_v28 }
 0x26b   : > { %vm1932_vm8 = vcmp.ge.f32.partialorder %v1897_v33, 0.0  ;;  %v1948_v26 = vmul.f32 0.1, %v1897_v33  ;;  %v1748_v44 = vsel %vm1732_vm0, %v1731_v1, %v1491_v45 }
 0x26c   : > { %v1765_v49 = vsel %vm1749_vm3, %v1748_v44, %v1541_v52 }
 0x26d   : > { %v1964_v60 = vsel %vm1932_vm8, %v1897_v33, %v1948_v26 }
 0x26e   : > { %1980 = vst.msk [vmem:[%s3183_s6 + $0x30] sm:$0xff] %vm1681_vm2, %v1964_v60  ;;  %v1632_v48 = vpop.permute.xlu0 %1631 }
 0x271   : > { %v1579_v50 = vpop.permute.xlu1 %1578 }
 0x272   : > { %v1774_v12 = vsel %vm3433_vm7, %v1757_v8, %v1579_v50 }
 0x273   : > { %v1791_v17 = vsel %vm1783_vm5, %v1774_v12, %v1632_v48 }
 0x274   : > { %2119 = vmatmul.msk.f32.gmra.mxu1 %vm3434_vm13, %v1791_v17 }
 0x276   : > { %v1424_v20 = vpop.permute.xlu0 %1423 }
 0x277   : > { %v1724_v0 = vsel %vm1715_vm15, %v3082_v21, %v1424_v20 }
 0x279   : > { %v1595_v15 = vpop.permute.xlu1 %1594 }
 0x27a   : > { %v1782_v10 = vsel %vm3435_vm10, %v1765_v49, %v1595_v15 }
 0x27b   : > { %v1799_v43 = vsel %vm1783_vm5, %v1782_v10, %v1648_v19 }
 0x27c   : > { %2127 = vmatmul.msk.f32.gmra.mxu3 %vm3436_vm14, %v1799_v43 }
 0x27e   : > { %v1581_v5 = vpop.permute.xlu0 %1580 }
 0x281   : > { %v1477_v23 = vpop.permute.xlu1 %1476 }
 0x282   : > { %v1741_v57 = vsel %vm1732_vm0, %v1724_v0, %v1477_v23 }
 0x283   : > { %v1758_v47 = vsel %vm1749_vm3, %v1741_v57, %v1527_v59 }
 0x284   : > { %v1775_v32 = vsel %vm3437_vm11, %v1758_v47, %v1581_v5 }
 0x289   : > { %v1634_v53 = vpop.permute.xlu1 %1633 }
 0x28a   : > { %v1792_v31 = vsel %vm1783_vm5, %v1775_v32, %v1634_v53 }
 0x28b   : > { %2120 = vmatmul.msk.f32.gmra.mxu1 %vm3438_vm12, %v1792_v31 }
 0x29f   : > { %v1905_v36 = vpop.f32.mrf.mxu3 }
 0x2a0   : > { %v1906_v38 = vadd.f32 %v3167_v18, %v1905_v36 }
 0x2a2   : > { %vm1935_vm6 = vcmp.ge.f32.partialorder %v1906_v38, 0.0  ;;  %v1951_v21 = vmul.f32 0.1, %v1906_v38 }
 0x2a4   : > { %v1967_v61 = vsel %vm1935_vm6, %v1906_v38, %v1951_v21 }
 0x2a5   : > { %1983 = vst.msk [vmem:[%s3183_s6 + $0x48] sm:$0xff] %vm1681_vm2, %v1967_v61 }
 0x2ab   : > { %v1908_v25 = vpop.f32.mrf.mxu3 }
 0x2ac   : > { %v1909_v62 = vadd.f32 %v3167_v18, %v1908_v25 }
 0x2ae   : > { %vm1936_vm15 = vcmp.ge.f32.partialorder %v1909_v62, 0.0  ;;  %v1952_v37 = vmul.f32 0.1, %v1909_v62 }
 0x2b0   : > { %v1968_v58 = vsel %vm1936_vm15, %v1909_v62, %v1952_v37 }
 0x2b1   : > { %1984 = vst.msk [vmem:[%s3183_s6 + $0x50] sm:$0xff] %vm1681_vm2, %v1968_v58 }
 0x2b6   : > { %v1911_v14 = vpop.f32.mrf.mxu3 }
 0x2b7   : > { %v1912_v39 = vadd.f32 %v3167_v18, %v1911_v14 }
 0x2b9   : > { %vm1937_vm0 = vcmp.ge.f32.partialorder %v1912_v39, 0.0  ;;  %v1953_v63 = vmul.f32 0.1, %v1912_v39 }
 0x2bb   : > { %v1969_v55 = vsel %vm1937_vm0, %v1912_v39, %v1953_v63 }
 0x2bc   : > { %1985 = vst.msk [vmem:[%s3183_s6 + $0x58] sm:$0xff] %vm1681_vm2, %v1969_v55 }
 0x2d7   : > { %v1914_v6 = vpop.f32.mrf.mxu3 }
 0x2d8   : > { %v1915_v9 = vadd.f32 %v3167_v18, %v1914_v6 }
 0x2da   : > { %vm1938_vm3 = vcmp.ge.f32.partialorder %v1915_v9, 0.0  ;;  %v1954_v13 = vmul.f32 0.1, %v1915_v9 }
 0x2dc   : > { %v1970_v30 = vsel %vm1938_vm3, %v1915_v9, %v1954_v13 }
 0x2dd   : > { %1986 = vst.msk [vmem:[%s3183_s6 + $0x60] sm:$0xff] %vm1681_vm2, %v1970_v30 }
 0x2df   : > { %v1917_v2 = vpop.f32.mrf.mxu3 }
 0x2e0   : > { %v1918_v29 = vadd.f32 %v3167_v18, %v1917_v2 }
 0x2e2   : > { %vm1939_vm5 = vcmp.ge.f32.partialorder %v1918_v29, 0.0  ;;  %v1955_v3 = vmul.f32 0.1, %v1918_v29 }
 0x2e4   : > { %v1971_v11 = vsel %vm1939_vm5, %v1918_v29, %v1955_v3 }
 0x2e5   : > { %1987 = vst.msk [vmem:[%s3183_s6 + $0x68] sm:$0xff] %vm1681_vm2, %v1971_v11 }
 0x2e7   : > { %v1920_v56 = vpop.f32.mrf.mxu3 }
 0x2e8   : > { %v1921_v51 = vadd.f32 %v3167_v18, %v1920_v56 }
 0x2ea   : > { %vm1940_vm1 = vcmp.ge.f32.partialorder %v1921_v51, 0.0  ;;  %v1956_v24 = vmul.f32 0.1, %v1921_v51 }
 0x2ec   : > { %v1972_v22 = vsel %vm1940_vm1, %v1921_v51, %v1956_v24 }
 0x2ed   : > { %1988 = vst.msk [vmem:[%s3183_s6 + $0x70] sm:$0xff] %vm1681_vm2, %v1972_v22 }
 0x2f1   : > { %v1899_v54 = vpop.f32.mrf.mxu1 }
 0x2f2   : > { %v1900_v46 = vadd.f32 %v3167_v18, %v1899_v54 }
 0x2f4   : > { %vm1933_vm4 = vcmp.ge.f32.partialorder %v1900_v46, 0.0  ;;  %v1949_v41 = vmul.f32 0.1, %v1900_v46 }
 0x2f6   : > { %v1965_v34 = vsel %vm1933_vm4, %v1900_v46, %v1949_v41 }
 0x2f7   : > { %1981 = vst.msk [vmem:[%s3183_s6 + $0x38] sm:$0xff] %vm1681_vm2, %v1965_v34 }
 0x2ff   : > { %v1923_v40 = vpop.f32.mrf.mxu3 }
 0x300   : > { %v1924_v16 = vadd.f32 %v3167_v18, %v1923_v40 }
 0x302   : > { %vm1941_vm9 = vcmp.ge.f32.partialorder %v1924_v16, 0.0  ;;  %v1957_v35 = vmul.f32 0.1, %v1924_v16 }
 0x304   : > { %v1973_v45 = vsel %vm1941_vm9, %v1924_v16, %v1957_v35 }
 0x305   : > { %1989 = vst.msk [vmem:[%s3183_s6 + $0x78] sm:$0xff] %vm1681_vm2, %v1973_v45 }
 0x308   : > { %v1902_v4 = vpop.f32.mrf.mxu1 }
 0x309   : > { %v1903_v33 = vadd.f32 %v3167_v18, %v1902_v4 }
 0x30b   : > { %vm1934_vm8 = vcmp.ge.f32.partialorder %v1903_v33, 0.0  ;;  %v1950_v28 = vmul.f32 0.1, %v1903_v33 }
 0x30d   : > { %v1966_v26 = vsel %vm1934_vm8, %v1903_v33, %v1950_v28 }
 0x30e   : > { %1982 = vst.msk [vmem:[%s3183_s6 + $0x40] sm:$0xff] %vm1681_vm2, %v1966_v26 }
 0x30f PF: > { %s15_s22 = sadd.s32 1, %s2227_s22   ;;  %s3439_s18 = smov %s2219_s20 }
 0x310   : > { %p12_p7 = scmp.ge.s32.totalorder %s15_s22, 6   ;;  %s3440_s19 = smov %s2223_s21 }
 0x311   : > { %s3441_s20 = smov %s3444_s23  ;;  %s3442_s21 = smov %s3448_s24 }
 0x312   :  { %14 = sbr.rel (!%p12_p7) target bundleno = 3 (0x3), region = 85 }

</bundles_post_ra>
